<compile_context>
chip_gen: v7x
topology: tpu7x:2x2x1
jax: 0.10.0
libtpu: 0.0.40
codegen_flags: <defaults>
</compile_context>

<pallas_src>
import numpy as np
import jax
import jax.numpy as jnp
from jax import lax
from jax.experimental import pallas as pl
from jax.experimental.pallas import tpu as pltpu


# ---------------------------------------------------------------------------
# Host-side weight packing (one-time parameter preprocessing, plain glue).
# ---------------------------------------------------------------------------
def _pack_conv_weight_banded(w_hwio, w_sp):
    """(Kh, Kw, Cin, Cout) HWIO -> (Kh*w_sp*Cin, w_sp*Cout) stacked banded matrix.

    Row-block kh implements the W-direction convolution (taps kw plus 'same'
    zero padding in W) as a matmul on a lane-dense (rows, w_sp*Cin) activation
    slab. Stacking the Kh blocks along the contraction dim lets the whole conv
    be a single matmul against taps concatenated along lanes (im2row), or be
    sliced per tap with w[kh*w_sp*Cin:(kh+1)*w_sp*Cin, :].
    """
    Kh, Kw, Cin, Cout = w_hwio.shape
    # TODO(synk): even kernel sizes need PyTorch's asymmetric 'same' padding.
    assert Kh % 2 == 1 and Kw % 2 == 1, "odd kernel sizes only"
    pw = (Kw - 1) // 2
    w_np = np.asarray(w_hwio, dtype=np.float32)
    m = np.zeros((Kh, w_sp * Cin, w_sp * Cout), np.float32)
    for kh in range(Kh):
        for wo in range(w_sp):
            for kw in range(Kw):
                wi = wo + kw - pw
                if 0 <= wi < w_sp:
                    m[kh, wi * Cin:(wi + 1) * Cin,
                      wo * Cout:(wo + 1) * Cout] = w_np[kh, kw]
    return jnp.asarray(m.reshape(Kh * w_sp * Cin, w_sp * Cout))


def _pack_bias(b, w_sp):
    """(Cout,) -> (1, w_sp*Cout) row, broadcastable over the lane-dense layout."""
    return jnp.tile(jnp.asarray(b, jnp.float32), w_sp).reshape(1, -1)


# ---------------------------------------------------------------------------
# Tiling heuristics.
# ---------------------------------------------------------------------------
def _choose_nb(N, H, target_rows=512):
    """Batch tile: want nb*H rows per grid step in ~[256, 1024]; nb a multiple
    of 8 (sublane-aligned batch dim) or the full batch; keep >= 2 grid steps
    when possible so both v7x TensorCores get work."""
    if N % 8 != 0 or N <= 8:
        return N
    target = max(8, (target_rows // max(H, 1)) // 8 * 8)
    target = min(target, max(8, (N // 2) // 8 * 8))      # keep grid length >= 2
    best, d = 8, 8
    while d <= min(target, N):
        if N % d == 0:
            best = d
        d += 8
    return best


def _choose_hc(H, nb, target_rows=128):
    """Inner H-chunk: HC*nb rows per matmul (~128-256) to bound vreg pressure."""
    hc = min(max(1, target_rows // max(nb, 1)), H)
    while H % hc != 0:
        hc -= 1
    return hc


# ---------------------------------------------------------------------------
# Fused ResBlock Pallas kernel.
# Refs: x, [wf, bf], w1, b1, w2, b2, out, pad_x, pad_f
# Activation layout everywhere: (H, N, W*C)  (H-major, lane-dense last dim).
# ---------------------------------------------------------------------------
def _make_resblock_kernel(*, Kh, H, HC, WC, WCin, has_first, pack_taps):
    ph = (Kh - 1) // 2
    nchunks = H // HC

    def conv_from(pad_ref, w_ref, h0, NB):
        """'same'-in-H conv of the padded buffer, output rows [h0, h0+HC)."""
        if pack_taps:
            # Taps concatenated along lanes -> one K = Kh*WC contraction,
            # filling the 256-deep MXU on v6e/v7x (neutral on v5e).
            slab = jnp.concatenate(
                [pad_ref[pl.ds(h0 + kh, HC), :, :].reshape(HC * NB, WC)
                 for kh in range(Kh)], axis=-1)
            return jnp.dot(slab, w_ref[...], preferred_element_type=jnp.float32)
        acc = jnp.zeros((HC * NB, WC), jnp.float32)
        for kh in range(Kh):                               # static, small Kh
            acc = acc + jnp.dot(
                pad_ref[pl.ds(h0 + kh, HC), :, :].reshape(HC * NB, WC),
                w_ref[kh * WC:(kh + 1) * WC, :],
                preferred_element_type=jnp.float32)
        return acc

    def kernel(*refs):
        if has_first:
            (x_ref, wf_ref, bf_ref, w1_ref, b1_ref, w2_ref, b2_ref,
             o_ref, px_ref, pf_ref) = refs
        else:
            (x_ref, w1_ref, b1_ref, w2_ref, b2_ref,
             o_ref, px_ref, pf_ref) = refs

        NB = x_ref.shape[1]

        # 'same' padding in H: halo rows must be zero. They are never written
        # below, but scratch is per-TensorCore, so zero them *every* grid step
        # (only 2*ph tiny rows, not the whole buffer) -- this keeps the
        # "parallel" grid axis safe to shard across v7x cores, where a
        # program_id==0-only init would miss the second core's scratch.
        if ph > 0:
            for ref in (px_ref, pf_ref):
                ref[:ph, :, :] = jnp.zeros((ph, NB, WC), ref.dtype)
                ref[ph + H:, :, :] = jnp.zeros((Kh - 1 - ph, NB, WC), ref.dtype)

        # Work in HC-row chunks (HC*NB rows per matmul); intermediates live in
        # VMEM scratch between stages so nothing (rows, WC)-sized has to stay
        # resident in vregs across the whole (large) batch tile.

        # ---- stage 0: y0 = if_first(x) (or identity) -> padded scratch -----
        def stage0(c, carry):
            h0 = pl.multiple_of(c * HC, HC)
            if has_first:
                x2d = x_ref[pl.ds(h0, HC), :, :].reshape(HC * NB, WCin)
                y0 = jnp.dot(x2d, wf_ref[...], preferred_element_type=jnp.float32)
                y0 = y0 + bf_ref[...]                      # bias in f32
                px_ref[pl.ds(ph + h0, HC), :, :] = (
                    y0.reshape(HC, NB, WC).astype(px_ref.dtype))
            else:
                px_ref[pl.ds(ph + h0, HC), :, :] = x_ref[pl.ds(h0, HC), :, :]
            return carry

        # ---- stage 1: fx = relu(conv1(y0) + b1) -> padded scratch ----------
        def stage1(c, carry):
            h0 = pl.multiple_of(c * HC, HC)
            acc = conv_from(px_ref, w1_ref, h0, NB)
            fx = jnp.maximum(acc + b1_ref[...], 0.0)       # bias+ReLU in f32
            pf_ref[pl.ds(ph + h0, HC), :, :] = (
                fx.reshape(HC, NB, WC).astype(pf_ref.dtype))
            return carry

        # ---- stage 2: out = relu(conv2(fx) + b2 + y0) ----------------------
        def stage2(c, carry):
            h0 = pl.multiple_of(c * HC, HC)
            acc2 = conv_from(pf_ref, w2_ref, h0, NB)
            res = px_ref[pl.ds(ph + h0, HC), :, :].reshape(HC * NB, WC)
            out = jnp.maximum(acc2 + b2_ref[...] + res.astype(jnp.float32), 0.0)
            o_ref[pl.ds(h0, HC), :, :] = (
                out.reshape(HC, NB, WC).astype(o_ref.dtype))
            return carry

        lax.fori_loop(0, nchunks, stage0, 0, unroll=True)
        lax.fori_loop(0, nchunks, stage1, 0, unroll=True)
        lax.fori_loop(0, nchunks, stage2, 0, unroll=True)

    return kernel


def resblock_forward(x_nhwc, packed, *, filters, kernel_size, first_layer,
                     compute_dtype=jnp.bfloat16, nb=None):
    """x_nhwc: (N, H, W, Cin). Returns (N, H, W, filters) in x_nhwc.dtype."""
    N, H, W, Cin = x_nhwc.shape
    Kh, Kw = kernel_size
    WC = W * filters
    WCin = W * Cin
    Hpad = H + Kh - 1

    nb = _choose_nb(N, H) if nb is None else nb
    assert N % nb == 0, "batch tile must divide N"
    HC = _choose_hc(H, nb)
    # bf16 path packs all H-taps into one K=Kh*WC matmul (fills 256-deep MXU on
    # v6e/v7x); f32 keeps per-tap K=128 dots so the im2row slab never blows the
    # register file.
    pack_taps = jnp.dtype(compute_dtype).itemsize <= 2

    # H-major lane-dense layout (H, N, W*C): tap reads in the kernel slice only
    # the leading (untiled) dim -> always sublane-aligned. Cast to the compute
    # dtype at the boundary (halves activation DMA for bf16).
    x_hwn = jnp.transpose(x_nhwc, (1, 0, 2, 3)).reshape(H, N, WCin)
    x_hwn = x_hwn.astype(compute_dtype)

    args = [x_hwn]
    in_specs = [pl.BlockSpec((H, nb, WCin), lambda n: (0, n, 0))]
    if first_layer:
        wf, bf = packed["wf"], packed["bf"]
        args += [wf, bf]
        in_specs += [pl.BlockSpec(wf.shape, lambda n: (0, 0)),
                     pl.BlockSpec((1, WC), lambda n: (0, 0))]
    w1, b1, w2, b2 = packed["w1"], packed["b1"], packed["w2"], packed["b2"]
    args += [w1, b1, w2, b2]
    in_specs += [pl.BlockSpec(w1.shape, lambda n: (0, 0)),
                 pl.BlockSpec((1, WC), lambda n: (0, 0)),
                 pl.BlockSpec(w2.shape, lambda n: (0, 0)),
                 pl.BlockSpec((1, WC), lambda n: (0, 0))]

    kernel = _make_resblock_kernel(Kh=Kh, H=H, HC=HC, WC=WC, WCin=WCin,
                                   has_first=first_layer, pack_taps=pack_taps)

    out = pl.pallas_call(
        kernel,
        out_shape=jax.ShapeDtypeStruct((H, N, WC), x_nhwc.dtype),
        grid_spec=pltpu.PrefetchScalarGridSpec(
            num_scalar_prefetch=0,
            grid=(N // nb,),
            in_specs=in_specs,
            out_specs=pl.BlockSpec((H, nb, WC), lambda n: (0, n, 0)),
            scratch_shapes=[pltpu.VMEM((Hpad, nb, WC), compute_dtype),   # padded y0
                            pltpu.VMEM((Hpad, nb, WC), compute_dtype)], # padded fx
        ),
        compiler_params=pltpu.CompilerParams(
            # Batch-tile axis is embarrassingly parallel -> shardable across
            # v7x's 2 TensorCores. Per-step VMEM is ~2 MiB at nb=32, so the
            # 32 MiB scoped limit is safe on every generation (incl. v7x 64 MiB).
            dimension_semantics=("parallel",),
            vmem_limit_bytes=32 * 1024 * 1024,
        ),
    )(*args)

    return jnp.transpose(out.reshape(H, N, W, filters), (1, 0, 2, 3))


# ---------------------------------------------------------------------------
# ResBlock wrapper (parameter setup / packing is host-side glue).
# ---------------------------------------------------------------------------
class ResBlockPallas:
    def __init__(self, filters, kernel_size, first_layer=False, key=None):
        if isinstance(kernel_size, int):
            kernel_size = (kernel_size, kernel_size)
        self.filters = filters
        self.kernel_size = kernel_size
        self.first_layer = first_layer

        key = jax.random.PRNGKey(0) if key is None else key
        k1, k2, k3, k4, k5, k6 = jax.random.split(key, 6)
        kh, kw = kernel_size
        scale = 0.1
        self.conv1_w = scale * jax.random.normal(k1, (kh, kw, filters, filters), jnp.float32)
        self.conv1_b = scale * jax.random.normal(k2, (filters,), jnp.float32)
        self.conv2_w = scale * jax.random.normal(k3, (kh, kw, filters, filters), jnp.float32)
        self.conv2_b = scale * jax.random.normal(k4, (filters,), jnp.float32)
        if first_layer:
            cin0 = int(filters / 2)
            self.if_first_w = scale * jax.random.normal(k5, (1, 1, cin0, filters), jnp.float32)
            self.if_first_b = scale * jax.random.normal(k6, (filters,), jnp.float32)
        self._packed_cache = {}

    def _packed(self, W, dtype):
        key = (W, jnp.dtype(dtype).name)
        if key in self._packed_cache:
            return self._packed_cache[key]
        p = {
            "w1": _pack_conv_weight_banded(self.conv1_w, W).astype(dtype),
            "b1": _pack_bias(self.conv1_b, W),                 # biases stay f32
            "w2": _pack_conv_weight_banded(self.conv2_w, W).astype(dtype),
            "b2": _pack_bias(self.conv2_b, W),
        }
        if self.first_layer:
            p["wf"] = _pack_conv_weight_banded(self.if_first_w, W).astype(dtype)
            p["bf"] = _pack_bias(self.if_first_b, W)
        self._packed_cache[key] = p
        return p

    def __call__(self, x_nhwc, compute_dtype=jnp.bfloat16, nb=None):
        W = x_nhwc.shape[2]
        return resblock_forward(
            x_nhwc, self._packed(W, compute_dtype),
            filters=self.filters, kernel_size=self.kernel_size,
            first_layer=self.first_layer, compute_dtype=compute_dtype, nb=nb)


# ---------------------------------------------------------------------------
# Pure-JAX reference (correctness check only).
# ---------------------------------------------------------------------------
def _conv_same_ref(x, w, b):
    kh, kw = w.shape[0], w.shape[1]
    pads = [((k - 1) // 2, (k - 1) - (k - 1) // 2) for k in (kh, kw)]
    y = lax.conv_general_dilated(x, w, (1, 1), pads,
                                 dimension_numbers=('NHWC', 'HWIO', 'NHWC'))
    return y + b.reshape(1, 1, 1, -1)


def resblock_ref(block, x):
    if block.first_layer:
        x = _conv_same_ref(x, block.if_first_w, block.if_first_b)
    fx = jax.nn.relu(_conv_same_ref(x, block.conv1_w, block.conv1_b))
    return jax.nn.relu(x + _conv_same_ref(fx, block.conv2_w, block.conv2_b))


if __name__ == "__main__":
    key = jax.random.PRNGKey(0)
    kx1, kx2, kp1, kp2 = jax.random.split(key, 4)

    filters, kernel_size = 8, 3

    # Case 1: first_layer=True (1x1 lift filters/2 -> filters), NCHW like torch.
    N, Cin, H, W = 2, filters // 2, 16, 16
    x_nchw = jax.random.normal(kx1, (N, Cin, H, W), jnp.float32)
    x_nhwc = jnp.transpose(x_nchw, (0, 2, 3, 1))          # layout glue
    blk1 = ResBlockPallas(filters, kernel_size, first_layer=True, key=kp1)
    ref1 = resblock_ref(blk1, x_nhwc)

    out_f32 = jax.block_until_ready(blk1(x_nhwc, compute_dtype=jnp.float32))
    assert out_f32.shape == (N, H, W, filters), out_f32.shape
    err_f32 = float(jnp.max(jnp.abs(out_f32 - ref1)))
    assert jnp.allclose(out_f32, ref1, atol=2e-3, rtol=2e-3), err_f32

    out_bf16 = jax.block_until_ready(blk1(x_nhwc))        # bf16 compute, f32 accum
    err_bf16 = float(jnp.max(jnp.abs(out_bf16 - ref1)))
    assert jnp.allclose(out_bf16, ref1, atol=5e-2, rtol=5e-2), err_bf16

    # Case 2: first_layer=False, batch multiple of 8 -> multi-step grid with an
    # 8-aligned batch tile; exercises the default bf16 / tap-packed path.
    N2 = 16
    x2 = jax.random.normal(kx2, (N2, H, W, filters), jnp.float32)
    blk2 = ResBlockPallas(filters, kernel_size, first_layer=False, key=kp2)
    ref2 = resblock_ref(blk2, x2)
    out2 = jax.block_until_ready(blk2(x2))
    err2 = float(jnp.max(jnp.abs(out2 - ref2)))
    assert jnp.allclose(out2, ref2, atol=5e-2, rtol=5e-2), err2

    print("KERNEL_OK")
</pallas_src>

<mosaic_0001>
module attributes {stable_mosaic.version = 11 : i64} {
  func.func @kernel(%arg0: i32, %arg1: memref<16x2x64xf32, #tpu.memory_space<vmem>>, %arg2: memref<64x128xf32, #tpu.memory_space<vmem>>, %arg3: memref<1x128xf32, #tpu.memory_space<vmem>>, %arg4: memref<384x128xf32, #tpu.memory_space<vmem>>, %arg5: memref<1x128xf32, #tpu.memory_space<vmem>>, %arg6: memref<384x128xf32, #tpu.memory_space<vmem>>, %arg7: memref<1x128xf32, #tpu.memory_space<vmem>>, %arg8: memref<16x2x128xf32, #tpu.memory_space<vmem>>, %arg9: memref<18x2x128xf32, #tpu.memory_space<vmem>>, %arg10: memref<18x2x128xf32, #tpu.memory_space<vmem>>) attributes {dimension_semantics = [#tpu.dimension_semantics<parallel>], iteration_bounds = array<i64: 1>, scalar_prefetch = 0 : i64, scratch_operands = 2 : i64, tpu.core_type = #tpu.core_type<tc>, window_params = [{transform_indices = @transform_0, window_bounds = array<i64: 16, 2, 64>}, {pipeline_mode = #tpu.pipeline_mode<synchronous>, transform_indices = @transform_1, window_bounds = array<i64: 64, 128>}, {pipeline_mode = #tpu.pipeline_mode<synchronous>, transform_indices = @transform_2, window_bounds = array<i64: 1, 128>}, {pipeline_mode = #tpu.pipeline_mode<synchronous>, transform_indices = @transform_3, window_bounds = array<i64: 384, 128>}, {pipeline_mode = #tpu.pipeline_mode<synchronous>, transform_indices = @transform_4, window_bounds = array<i64: 1, 128>}, {pipeline_mode = #tpu.pipeline_mode<synchronous>, transform_indices = @transform_5, window_bounds = array<i64: 384, 128>}, {pipeline_mode = #tpu.pipeline_mode<synchronous>, transform_indices = @transform_6, window_bounds = array<i64: 1, 128>}, {transform_indices = @transform_7, window_bounds = array<i64: 16, 2, 128>}]} {
    %cst = arith.constant 0.000000e+00 : f32
    %0 = vector.broadcast %cst : f32 to vector<1x2x128xf32>
    %c0 = arith.constant 0 : index
    %c0_0 = arith.constant 0 : index
    %c0_1 = arith.constant 0 : index
    %1 = vector.load %arg9[%c0, %c0_0, %c0_1] : memref<18x2x128xf32, #tpu.memory_space<vmem>>, vector<1x2x128xf32>
    tpu.vector_store %arg9[%c0, %c0_0, %c0_1], %0 {strides = array<i32>} : memref<18x2x128xf32, #tpu.memory_space<vmem>>, vector<1x2x128xf32>,
    %cst_2 = arith.constant 0.000000e+00 : f32
    %2 = vector.broadcast %cst_2 : f32 to vector<1x2x128xf32>
    %c17 = arith.constant 17 : index
    %c0_3 = arith.constant 0 : index
    %c0_4 = arith.constant 0 : index
    %3 = vector.load %arg9[%c17, %c0_3, %c0_4] : memref<18x2x128xf32, #tpu.memory_space<vmem>>, vector<1x2x128xf32>
    tpu.vector_store %arg9[%c17, %c0_3, %c0_4], %2 {strides = array<i32>} : memref<18x2x128xf32, #tpu.memory_space<vmem>>, vector<1x2x128xf32>,
    %cst_5 = arith.constant 0.000000e+00 : f32
    %4 = vector.broadcast %cst_5 : f32 to vector<1x2x128xf32>
    %c0_6 = arith.constant 0 : index
    %c0_7 = arith.constant 0 : index
    %c0_8 = arith.constant 0 : index
    %5 = vector.load %arg10[%c0_6, %c0_7, %c0_8] : memref<18x2x128xf32, #tpu.memory_space<vmem>>, vector<1x2x128xf32>
    tpu.vector_store %arg10[%c0_6, %c0_7, %c0_8], %4 {strides = array<i32>} : memref<18x2x128xf32, #tpu.memory_space<vmem>>, vector<1x2x128xf32>,
    %cst_9 = arith.constant 0.000000e+00 : f32
    %6 = vector.broadcast %cst_9 : f32 to vector<1x2x128xf32>
    %c17_10 = arith.constant 17 : index
    %c0_11 = arith.constant 0 : index
    %c0_12 = arith.constant 0 : index
    %7 = vector.load %arg10[%c17_10, %c0_11, %c0_12] : memref<18x2x128xf32, #tpu.memory_space<vmem>>, vector<1x2x128xf32>
    tpu.vector_store %arg10[%c17_10, %c0_11, %c0_12], %6 {strides = array<i32>} : memref<18x2x128xf32, #tpu.memory_space<vmem>>, vector<1x2x128xf32>,
    %c0_i32 = arith.constant 0 : i32
    %c16_i32 = arith.constant 16 : i32
    %8 = arith.muli %c0_i32, %c16_i32 : i32
    %9 = tpu.assume_multiple %8, 16 : i32
    %10 = arith.index_cast %9 : i32 to index
    %c0_13 = arith.constant 0 : index
    %c0_14 = arith.constant 0 : index
    %11 = vector.load %arg1[%10, %c0_13, %c0_14] : memref<16x2x64xf32, #tpu.memory_space<vmem>>, vector<16x2x64xf32>
    %12 = vector.shape_cast %11 : vector<16x2x64xf32> to vector<32x64xf32>
    %c0_15 = arith.constant 0 : index
    %c0_16 = arith.constant 0 : index
    %13 = vector.load %arg2[%c0_15, %c0_16] : memref<64x128xf32, #tpu.memory_space<vmem>>, vector<64x128xf32>
    %cst_17 = arith.constant dense<0.000000e+00> : vector<32x128xf32>
    %14 = tpu.matmul %12, %13, %cst_17 {dimension_numbers = #tpu.dot_dimension_numbers<[1], [0], [0], [1], [0, 0, 1, 1], [], []>} : vector<32x64xf32>, vector<64x128xf32>, vector<32x128xf32> -> vector<32x128xf32>
    %c0_18 = arith.constant 0 : index
    %c0_19 = arith.constant 0 : index
    %15 = vector.load %arg3[%c0_18, %c0_19] : memref<1x128xf32, #tpu.memory_space<vmem>>, vector<1x128xf32>
    %16 = vector.broadcast %15 : vector<1x128xf32> to vector<32x128xf32>
    %17 = arith.addf %14, %16 : vector<32x128xf32>
    %18 = vector.shape_cast %17 : vector<32x128xf32> to vector<16x2x128xf32>
    %c1_i32 = arith.constant 1 : i32
    %19 = arith.addi %c1_i32, %9 : i32
    %20 = arith.index_cast %19 : i32 to index
    %c0_20 = arith.constant 0 : index
    %c0_21 = arith.constant 0 : index
    %21 = vector.load %arg9[%20, %c0_20, %c0_21] : memref<18x2x128xf32, #tpu.memory_space<vmem>>, vector<16x2x128xf32>
    tpu.vector_store %arg9[%20, %c0_20, %c0_21], %18 {strides = array<i32>} : memref<18x2x128xf32, #tpu.memory_space<vmem>>, vector<16x2x128xf32>,
    %c1_i32_22 = arith.constant 1 : i32
    %c0_i32_23 = arith.constant 0 : i32
    %c16_i32_24 = arith.constant 16 : i32
    %22 = arith.muli %c0_i32_23, %c16_i32_24 : i32
    %23 = tpu.assume_multiple %22, 16 : i32
    %cst_25 = arith.constant 0.000000e+00 : f32
    %24 = vector.broadcast %cst_25 : f32 to vector<32x128xf32>
    %c0_i32_26 = arith.constant 0 : i32
    %25 = arith.addi %23, %c0_i32_26 : i32
    %26 = arith.index_cast %25 : i32 to index
    %c0_27 = arith.constant 0 : index
    %c0_28 = arith.constant 0 : index
    %27 = vector.load %arg9[%26, %c0_27, %c0_28] : memref<18x2x128xf32, #tpu.memory_space<vmem>>, vector<16x2x128xf32>
    %28 = vector.shape_cast %27 : vector<16x2x128xf32> to vector<32x128xf32>
    %c0_29 = arith.constant 0 : index
    %c0_30 = arith.constant 0 : index
    %29 = vector.load %arg4[%c0_29, %c0_30] : memref<384x128xf32, #tpu.memory_space<vmem>>, vector<128x128xf32>
    %cst_31 = arith.constant dense<0.000000e+00> : vector<32x128xf32>
    %30 = tpu.matmul %28, %29, %cst_31 {dimension_numbers = #tpu.dot_dimension_numbers<[1], [0], [0], [1], [0, 0, 1, 1], [], []>} : vector<32x128xf32>, vector<128x128xf32>, vector<32x128xf32> -> vector<32x128xf32>
    %31 = arith.addf %24, %30 : vector<32x128xf32>
    %c1_i32_32 = arith.constant 1 : i32
    %32 = arith.addi %23, %c1_i32_32 : i32
    %33 = arith.index_cast %32 : i32 to index
    %c0_33 = arith.constant 0 : index
    %c0_34 = arith.constant 0 : index
    %34 = vector.load %arg9[%33, %c0_33, %c0_34] : memref<18x2x128xf32, #tpu.memory_space<vmem>>, vector<16x2x128xf32>
    %35 = vector.shape_cast %34 : vector<16x2x128xf32> to vector<32x128xf32>
    %c128 = arith.constant 128 : index
    %c0_35 = arith.constant 0 : index
    %36 = vector.load %arg4[%c128, %c0_35] : memref<384x128xf32, #tpu.memory_space<vmem>>, vector<128x128xf32>
    %cst_36 = arith.constant dense<0.000000e+00> : vector<32x128xf32>
    %37 = tpu.matmul %35, %36, %cst_36 {dimension_numbers = #tpu.dot_dimension_numbers<[1], [0], [0], [1], [0, 0, 1, 1], [], []>} : vector<32x128xf32>, vector<128x128xf32>, vector<32x128xf32> -> vector<32x128xf32>
    %38 = arith.addf %31, %37 : vector<32x128xf32>
    %c2_i32 = arith.constant 2 : i32
    %39 = arith.addi %23, %c2_i32 : i32
    %40 = arith.index_cast %39 : i32 to index
    %c0_37 = arith.constant 0 : index
    %c0_38 = arith.constant 0 : index
    %41 = vector.load %arg9[%40, %c0_37, %c0_38] : memref<18x2x128xf32, #tpu.memory_space<vmem>>, vector<16x2x128xf32>
    %42 = vector.shape_cast %41 : vector<16x2x128xf32> to vector<32x128xf32>
    %c256 = arith.constant 256 : index
    %c0_39 = arith.constant 0 : index
    %43 = vector.load %arg4[%c256, %c0_39] : memref<384x128xf32, #tpu.memory_space<vmem>>, vector<128x128xf32>
    %cst_40 = arith.constant dense<0.000000e+00> : vector<32x128xf32>
    %44 = tpu.matmul %42, %43, %cst_40 {dimension_numbers = #tpu.dot_dimension_numbers<[1], [0], [0], [1], [0, 0, 1, 1], [], []>} : vector<32x128xf32>, vector<128x128xf32>, vector<32x128xf32> -> vector<32x128xf32>
    %45 = arith.addf %38, %44 : vector<32x128xf32>
    %c0_41 = arith.constant 0 : index
    %c0_42 = arith.constant 0 : index
    %46 = vector.load %arg5[%c0_41, %c0_42] : memref<1x128xf32, #tpu.memory_space<vmem>>, vector<1x128xf32>
    %47 = vector.broadcast %46 : vector<1x128xf32> to vector<32x128xf32>
    %48 = arith.addf %45, %47 : vector<32x128xf32>
    %cst_43 = arith.constant 0.000000e+00 : f32
    %49 = vector.broadcast %cst_43 : f32 to vector<32x128xf32>
    %50 = arith.maximumf %48, %49 : vector<32x128xf32>
    %51 = vector.shape_cast %50 : vector<32x128xf32> to vector<16x2x128xf32>
    %c1_i32_44 = arith.constant 1 : i32
    %52 = arith.addi %c1_i32_44, %23 : i32
    %53 = arith.index_cast %52 : i32 to index
    %c0_45 = arith.constant 0 : index
    %c0_46 = arith.constant 0 : index
    %54 = vector.load %arg10[%53, %c0_45, %c0_46] : memref<18x2x128xf32, #tpu.memory_space<vmem>>, vector<16x2x128xf32>
    tpu.vector_store %arg10[%53, %c0_45, %c0_46], %51 {strides = array<i32>} : memref<18x2x128xf32, #tpu.memory_space<vmem>>, vector<16x2x128xf32>,
    %c1_i32_47 = arith.constant 1 : i32
    %c0_i32_48 = arith.constant 0 : i32
    %c16_i32_49 = arith.constant 16 : i32
    %55 = arith.muli %c0_i32_48, %c16_i32_49 : i32
    %56 = tpu.assume_multiple %55, 16 : i32
    %cst_50 = arith.constant 0.000000e+00 : f32
    %57 = vector.broadcast %cst_50 : f32 to vector<32x128xf32>
    %c0_i32_51 = arith.constant 0 : i32
    %58 = arith.addi %56, %c0_i32_51 : i32
    %59 = arith.index_cast %58 : i32 to index
    %c0_52 = arith.constant 0 : index
    %c0_53 = arith.constant 0 : index
    %60 = vector.load %arg10[%59, %c0_52, %c0_53] : memref<18x2x128xf32, #tpu.memory_space<vmem>>, vector<16x2x128xf32>
    %61 = vector.shape_cast %60 : vector<16x2x128xf32> to vector<32x128xf32>
    %c0_54 = arith.constant 0 : index
    %c0_55 = arith.constant 0 : index
    %62 = vector.load %arg6[%c0_54, %c0_55] : memref<384x128xf32, #tpu.memory_space<vmem>>, vector<128x128xf32>
    %cst_56 = arith.constant dense<0.000000e+00> : vector<32x128xf32>
    %63 = tpu.matmul %61, %62, %cst_56 {dimension_numbers = #tpu.dot_dimension_numbers<[1], [0], [0], [1], [0, 0, 1, 1], [], []>} : vector<32x128xf32>, vector<128x128xf32>, vector<32x128xf32> -> vector<32x128xf32>
    %64 = arith.addf %57, %63 : vector<32x128xf32>
    %c1_i32_57 = arith.constant 1 : i32
    %65 = arith.addi %56, %c1_i32_57 : i32
    %66 = arith.index_cast %65 : i32 to index
    %c0_58 = arith.constant 0 : index
    %c0_59 = arith.constant 0 : index
    %67 = vector.load %arg10[%66, %c0_58, %c0_59] : memref<18x2x128xf32, #tpu.memory_space<vmem>>, vector<16x2x128xf32>
    %68 = vector.shape_cast %67 : vector<16x2x128xf32> to vector<32x128xf32>
    %c128_60 = arith.constant 128 : index
    %c0_61 = arith.constant 0 : index
    %69 = vector.load %arg6[%c128_60, %c0_61] : memref<384x128xf32, #tpu.memory_space<vmem>>, vector<128x128xf32>
    %cst_62 = arith.constant dense<0.000000e+00> : vector<32x128xf32>
    %70 = tpu.matmul %68, %69, %cst_62 {dimension_numbers = #tpu.dot_dimension_numbers<[1], [0], [0], [1], [0, 0, 1, 1], [], []>} : vector<32x128xf32>, vector<128x128xf32>, vector<32x128xf32> -> vector<32x128xf32>
    %71 = arith.addf %64, %70 : vector<32x128xf32>
    %c2_i32_63 = arith.constant 2 : i32
    %72 = arith.addi %56, %c2_i32_63 : i32
    %73 = arith.index_cast %72 : i32 to index
    %c0_64 = arith.constant 0 : index
    %c0_65 = arith.constant 0 : index
    %74 = vector.load %arg10[%73, %c0_64, %c0_65] : memref<18x2x128xf32, #tpu.memory_space<vmem>>, vector<16x2x128xf32>
    %75 = vector.shape_cast %74 : vector<16x2x128xf32> to vector<32x128xf32>
    %c256_66 = arith.constant 256 : index
    %c0_67 = arith.constant 0 : index
    %76 = vector.load %arg6[%c256_66, %c0_67] : memref<384x128xf32, #tpu.memory_space<vmem>>, vector<128x128xf32>
    %cst_68 = arith.constant dense<0.000000e+00> : vector<32x128xf32>
    %77 = tpu.matmul %75, %76, %cst_68 {dimension_numbers = #tpu.dot_dimension_numbers<[1], [0], [0], [1], [0, 0, 1, 1], [], []>} : vector<32x128xf32>, vector<128x128xf32>, vector<32x128xf32> -> vector<32x128xf32>
    %78 = arith.addf %71, %77 : vector<32x128xf32>
    %c1_i32_69 = arith.constant 1 : i32
    %79 = arith.addi %c1_i32_69, %56 : i32
    %80 = arith.index_cast %79 : i32 to index
    %c0_70 = arith.constant 0 : index
    %c0_71 = arith.constant 0 : index
    %81 = vector.load %arg9[%80, %c0_70, %c0_71] : memref<18x2x128xf32, #tpu.memory_space<vmem>>, vector<16x2x128xf32>
    %82 = vector.shape_cast %81 : vector<16x2x128xf32> to vector<32x128xf32>
    %c0_72 = arith.constant 0 : index
    %c0_73 = arith.constant 0 : index
    %83 = vector.load %arg7[%c0_72, %c0_73] : memref<1x128xf32, #tpu.memory_space<vmem>>, vector<1x128xf32>
    %84 = vector.broadcast %83 : vector<1x128xf32> to vector<32x128xf32>
    %85 = arith.addf %78, %84 : vector<32x128xf32>
    %86 = arith.addf %85, %82 : vector<32x128xf32>
    %cst_74 = arith.constant 0.000000e+00 : f32
    %87 = vector.broadcast %cst_74 : f32 to vector<32x128xf32>
    %88 = arith.maximumf %86, %87 : vector<32x128xf32>
    %89 = vector.shape_cast %88 : vector<32x128xf32> to vector<16x2x128xf32>
    %90 = arith.index_cast %56 : i32 to index
    %c0_75 = arith.constant 0 : index
    %c0_76 = arith.constant 0 : index
    %91 = vector.load %arg8[%90, %c0_75, %c0_76] : memref<16x2x128xf32, #tpu.memory_space<vmem>>, vector<16x2x128xf32>
    tpu.vector_store %arg8[%90, %c0_75, %c0_76], %89 {strides = array<i32>} : memref<16x2x128xf32, #tpu.memory_space<vmem>>, vector<16x2x128xf32>,
    %c1_i32_77 = arith.constant 1 : i32
    return
  }
  func.func @transform_0(%arg0: i32) -> (i32, i32, i32) {
    %c0_i32 = arith.constant 0 : i32
    %c0_i32_0 = arith.constant 0 : i32
    %c0_i32_1 = arith.constant 0 : i32
    return %c0_i32, %arg0, %c0_i32_0 : i32, i32, i32
  }
  func.func @transform_1(%arg0: i32) -> (i32, i32) {
    %c0_i32 = arith.constant 0 : i32
    %c0_i32_0 = arith.constant 0 : i32
    %c0_i32_1 = arith.constant 0 : i32
    return %c0_i32, %c0_i32_0 : i32, i32
  }
  func.func @transform_2(%arg0: i32) -> (i32, i32) {
    %c0_i32 = arith.constant 0 : i32
    %c0_i32_0 = arith.constant 0 : i32
    %c0_i32_1 = arith.constant 0 : i32
    return %c0_i32, %c0_i32_0 : i32, i32
  }
  func.func @transform_3(%arg0: i32) -> (i32, i32) {
    %c0_i32 = arith.constant 0 : i32
    %c0_i32_0 = arith.constant 0 : i32
    %c0_i32_1 = arith.constant 0 : i32
    return %c0_i32, %c0_i32_0 : i32, i32
  }
  func.func @transform_4(%arg0: i32) -> (i32, i32) {
    %c0_i32 = arith.constant 0 : i32
    %c0_i32_0 = arith.constant 0 : i32
    %c0_i32_1 = arith.constant 0 : i32
    return %c0_i32, %c0_i32_0 : i32, i32
  }
  func.func @transform_5(%arg0: i32) -> (i32, i32) {
    %c0_i32 = arith.constant 0 : i32
    %c0_i32_0 = arith.constant 0 : i32
    %c0_i32_1 = arith.constant 0 : i32
    return %c0_i32, %c0_i32_0 : i32, i32
  }
  func.func @transform_6(%arg0: i32) -> (i32, i32) {
    %c0_i32 = arith.constant 0 : i32
    %c0_i32_0 = arith.constant 0 : i32
    %c0_i32_1 = arith.constant 0 : i32
    return %c0_i32, %c0_i32_0 : i32, i32
  }
  func.func @transform_7(%arg0: i32) -> (i32, i32, i32) {
    %c0_i32 = arith.constant 0 : i32
    %c0_i32_0 = arith.constant 0 : i32
    %c0_i32_1 = arith.constant 0 : i32
    return %c0_i32, %arg0, %c0_i32_0 : i32, i32, i32
  }
}

</mosaic_0001>

<bundles_post_ra>
// kernel: tpu_custom_call.1
= control target key start
LH: loop header
LB: loop body
LE: loop exit
PB: predicated region body
PF: predicated region fallthrough
CT: control target
= control target key end

     0   :  { %12 = vsyncpa [#allocation5], 0  ;;  %s3031_s0 = inlined_call_operand.hbm [shape: f32[16,2,64], index: 0, kind: input, shape index: {}]   ;;  %s3032_s1 = inlined_call_operand.hbm [shape: f32[64,128], index: 1, kind: input, shape index: {}]   ;;  %s3033_s2 = inlined_call_operand.vmem [shape: f32[1,128], index: 2, kind: input, shape index: {}]   ;;  %s3034_s3 = inlined_call_operand.hbm [shape: f32[384,128], index: 3, kind: input, shape index: {}]   ;;  %s3035_s4 = inlined_call_operand.vmem [shape: f32[1,128], index: 4, kind: input, shape index: {}]   ;;  %s3036_s5 = inlined_call_operand.hbm [shape: f32[384,128], index: 5, kind: input, shape index: {}]   ;;  %s3037_s6 = inlined_call_operand.vmem [shape: f32[1,128], index: 6, kind: input, shape index: {}]   ;;  %s3038_s7 = inlined_call_operand.hbm [shape: f32[16,2,128], index: 7, kind: output, shape index: {}]  }
   0x1   :  { %13 = vsyncpa [#allocation8], 0 }
   0x2   :  { %14 = vsyncpa [#allocation11], 0 }
   0x3   :  { %15 = vsyncpa [#allocation6], 0  ;;  %s2787_s24 = smov [#allocation7]   ;;  %s2669_s28 = scalar_lea.hbm %s3032_s1, 1024 }
   0x4   :  { %s33_s25 = sshll.u32 %s2787_s24, 4  ;;  %p2670_p0 = scmp.ne.s32.totalorder %s3032_s1, %s2669_s28  ;;  %s34_s25 = int_to_ptr.vmem [resolvable:$true] %s33_s25 }
   0x5   :  { %p2673_p1 = scmp.lt.u32.totalorder %s2669_s28, %s3032_s1 }
   0x7   :  { %p2675_p2 = pnand %p2673_p1, %p2670_p0 }
   0x9   :  { %2678 = shalt.err (!%p2675_p2)
}
   0xa   :  { %s2679_s10 = scalar_lea.vmem %s34_s25, 1024  ;;  %p2684_p4 = scmp.lt.s32.totalorder %s34_s25, %s34_s25 }
   0xb   :  { %p2680_p3 = scmp.ne.s32.totalorder %s34_s25, %s2679_s10  ;;  %p2685_p5 = scmp.lt.s32.totalorder %s2679_s10, %s2679_s10 }
   0xd   :  { %p2686_p6 = por %p2685_p5, %p2684_p4 }
   0xf   :  { %p2687_p7 = pnand %p2686_p6, %p2680_p3 }
  0x11   :  { %2690 = shalt.err (!%p2687_p7)
}
  0x12   :  { %s2788_s11 = smov 128   ;;  %s2789_s12 = smov 8  }
  0x13   :  { %39 = dma.hbm_to_vmem [thread:$0]  %s3032_s1, 1024, %s34_s25, [#allocation8], %s2788_s11, %s2788_s11, %s2789_s12  }
  0x14   :  { %s2790_s15 = smov [#allocation4]   ;;  %s2691_s19 = scalar_lea.hbm %s3031_s0, 512 }
  0x15   :  { %s21_s16 = sshll.u32 %s2790_s15, 4  ;;  %p2692_p8 = scmp.ne.s32.totalorder %s3031_s0, %s2691_s19  ;;  %s22_s16 = int_to_ptr.vmem [resolvable:$true] %s21_s16 }
  0x16   :  { %p2695_p9 = scmp.lt.u32.totalorder %s2691_s19, %s3031_s0 }
  0x18   :  { %p2697_p10 = pnand %p2695_p9, %p2692_p8 }
  0x1a   :  { %2700 = shalt.err (!%p2697_p10)
}
  0x1b   :  { %s2701_s24 = scalar_lea.vmem %s22_s16, 512  ;;  %p2706_p12 = scmp.lt.s32.totalorder %s22_s16, %s22_s16 }
  0x1c   :  { %p2702_p11 = scmp.ne.s32.totalorder %s22_s16, %s2701_s24  ;;  %p2707_p13 = scmp.lt.s32.totalorder %s2701_s24, %s2701_s24 }
  0x1e   :  { %p2708_p0 = por %p2707_p13, %p2706_p12 }
  0x20   :  { %p2709_p1 = pnand %p2708_p0, %p2702_p11 }
  0x22   :  { %2712 = shalt.err (!%p2709_p1)
}
  0x23   :  { %s2791_s1 = smov 32   ;;  %s2792_s25 = smov 2  }
  0x24   :  { %27 = dma.hbm_to_vmem [thread:$0]  %s3031_s0, 512, %s22_s16, [#allocation5], %s2791_s1, %s2791_s1, %s2792_s25  }
  0x25   :  { %s2793_s28 = smov [#allocation9]   ;;  %s2794_s30 = smov [#allocation10]  }
  0x26   :  { %s47_s29 = sshll.u32 %s2793_s28, 4  ;;  %s61_s8 = sshll.u32 %s2794_s30, 4  ;;  %s48_s29 = int_to_ptr.vmem [resolvable:$true] %s47_s29  ;;  %s2868_s8 = int_to_ptr.vmem [resolvable:$true] %s61_s8 }
  0x27   :  { %s2713_s13 = scalar_lea.hbm %s3034_s3, 6144 }
  0x28   :  { %p2714_p2 = scmp.ne.s32.totalorder %s3034_s3, %s2713_s13  ;;  %p2717_p3 = scmp.lt.u32.totalorder %s2713_s13, %s3034_s3 }
  0x2a   :  { %p2719_p4 = pnand %p2717_p3, %p2714_p2 }
  0x2c   :  { %2722 = shalt.err (!%p2719_p4)
}
  0x2d   :  { %s2723_s0 = scalar_lea.vmem %s48_s29, 6144  ;;  %p2728_p6 = scmp.lt.s32.totalorder %s48_s29, %s48_s29 }
  0x2e   :  { %p2724_p5 = scmp.ne.s32.totalorder %s48_s29, %s2723_s0  ;;  %p2729_p7 = scmp.lt.s32.totalorder %s2723_s0, %s2723_s0 }
  0x30   :  { %p2730_p8 = por %p2729_p7, %p2728_p6 }
  0x32   :  { %p2731_p9 = pnand %p2730_p8, %p2724_p5 }
  0x34   :  { %2734 = shalt.err (!%p2731_p9)
}
  0x35   :  { %53 = dma.hbm_to_vmem [thread:$0]  %s3034_s3, 6144, %s48_s29, [#allocation8], %s2788_s11, %s2788_s11, %s2789_s12  }
  0x36   :  { %s2735_s22 = scalar_lea.hbm %s3036_s5, 6144 }
  0x37   :  { %p2736_p10 = scmp.ne.s32.totalorder %s3036_s5, %s2735_s22  ;;  %p2739_p11 = scmp.lt.u32.totalorder %s2735_s22, %s3036_s5 }
  0x39   :  { %p2741_p12 = pnand %p2739_p11, %p2736_p10 }
  0x3b   :  { %2744 = shalt.err (!%p2741_p12)
}
  0x3c   :  { %s2745_s28 = scalar_lea.vmem %s2868_s8, 6144  ;;  %p2750_p0 = scmp.lt.s32.totalorder %s2868_s8, %s2868_s8 }
  0x3d   :  { %p2746_p13 = scmp.ne.s32.totalorder %s2868_s8, %s2745_s28  ;;  %p2751_p1 = scmp.lt.s32.totalorder %s2745_s28, %s2745_s28 }
  0x3f   :  { %p2752_p2 = por %p2751_p1, %p2750_p0 }
  0x41   :  { %p2753_p3 = pnand %p2752_p2, %p2746_p13 }
  0x43   :  { %2756 = shalt.err (!%p2753_p3)
}
  0x44   :  { %67 = dma.hbm_to_vmem [thread:$0]  %s3036_s5, 6144, %s2868_s8, [#allocation11], %s2788_s11, %s2788_s11, %s2789_s12  }
  0x45   :  { %2779 = dma.done.wait [#allocation5], 512  }
  0x46   :  { %2780 = vsyncadd [#allocation5], 4294966784 }
  0x47   :  { %2781 = dma.done.wait [#allocation8], 7168  }
  0x48   :  { %2782 = vsyncadd [#allocation8], 4294960128 }
  0x49   :  { %2783 = dma.done.wait [#allocation11], 6144  }
  0x4a   :  { %2784 = vsyncadd [#allocation11], 4294961152  ;;  %v2795_v0 = vmov 1983009808   ;;  %v142_v2 = vlaneseq  ;;  %v106_v5 = vld [vmem:[#allocation7] sm:$0xff]  ;;  %v107_v6 = vld [vmem:[#allocation7 + $0x8] sm:$0xff] }
  0x4b   :  { %v140_v1 = vunpack.c.l.s4 %v2795_v0  ;;  %v108_v7 = vld [vmem:[#allocation7 + $0x10] sm:$0xff]  ;;  %v2434_v8 = vpack.c.bf16 %v107_v6, %v106_v5  ;;  %v109_v9 = vld [vmem:[#allocation7 + $0x18] sm:$0xff]  ;;  %v110_v11 = vld [vmem:[#allocation7 + $0x20] sm:$0xff]  ;;  %vm205_vm0 = vcmask 523264  }
  0x4c   :  { %v143_v4 = vshrl.u32 %v142_v2, 7  ;;  %v2438_v10 = vpack.c.bf16 %v109_v9, %v108_v7  ;;  %v111_v12 = vld [vmem:[#allocation7 + $0x28] sm:$0xff]  ;;  %v90_v13 = vld [vmem:[#allocation4] sm:$0x3]  ;;  %v91_v15 = vld [vmem:[#allocation4 + $0x2] sm:$0x3] }
  0x4d   :  { %v141_v3 = vunpack.c.0.s8 %v140_v1  ;;  %2435 = vmatprep.subr.bf16.mxu0 %v2434_v8  ;;  %v92_v16 = vld [vmem:[#allocation4 + $0x4] sm:$0x3]  ;;  %v93_v17 = vld [vmem:[#allocation4 + $0x6] sm:$0x3]  ;;  %v112_v18 = vld [vmem:[#allocation7 + $0x30] sm:$0xff]  ;;  %v137_v20 = vcombine.low %v90_v13, %v91_v15  ;;  %v2442_v25 = vpack.c.bf16 %v111_v12, %v110_v11 }
  0x4e   :  { %2437 = vmatpush3.bf16.msra.mxu0 %v2434_v8  ;;  %v113_v19 = vld [vmem:[#allocation7 + $0x38] sm:$0xff]  ;;  %v138_v21 = vcombine.low %v92_v16, %v93_v17  ;;  %v94_v22 = vld [vmem:[#allocation4 + $0x8] sm:$0x3]  ;;  %v95_v23 = vld [vmem:[#allocation4 + $0xa] sm:$0x3] }
  0x4f   :  { %v2905_v14 = vsub.s32 %v141_v3, %v143_v4  ;;  %v96_v24 = vld [vmem:[#allocation4 + $0xc] sm:$0x3]  ;;  %2439 = vmatprep.subr.bf16.mxu0 %v2438_v10  ;;  %v97_v26 = vld [vmem:[#allocation4 + $0xe] sm:$0x3]  ;;  %v98_v27 = vld [vmem:[#allocation4 + $0x10] sm:$0x3]  ;;  %v154_v34 = vcombine.low %v94_v22, %v95_v23  ;;  %v2446_v45 = vpack.c.bf16 %v113_v19, %v112_v18 }
  0x50   :  { %v99_v28 = vld [vmem:[#allocation4 + $0x12] sm:$0x3]  ;;  %v100_v31 = vld [vmem:[#allocation4 + $0x14] sm:$0x3]  ;;  %v101_v32 = vld [vmem:[#allocation4 + $0x16] sm:$0x3]  ;;  %v155_v35 = vcombine.low %v96_v24, %v97_v26 }
  0x51   :  { %v145_v29 = vrot.slane %v137_v20, %v2905_v14  ;;  %v152_v30 = vrot.slane %v138_v21, %v2905_v14  ;;  %v102_v33 = vld [vmem:[#allocation4 + $0x18] sm:$0x3]  ;;  %v103_v36 = vld [vmem:[#allocation4 + $0x1a] sm:$0x3]  ;;  %v104_v37 = vld [vmem:[#allocation4 + $0x1c] sm:$0x3]  ;;  %v171_v40 = vcombine.low %v98_v27, %v99_v28  ;;  %v172_v41 = vcombine.low %v100_v31, %v101_v32 }
  0x52   :  { %v105_v38 = vld [vmem:[#allocation4 + $0x1e] sm:$0x3]  ;;  %2441 = vmatpush3.bf16.msra.mxu0 %v2438_v10  ;;  %v455_v42 = vld [vmem:[#allocation9 + $0x80] sm:$0xff]  ;;  %v456_v43 = vld [vmem:[#allocation9 + $0x88] sm:$0xff]  ;;  %v162_v49 = vrot.slane %v154_v34, %v2905_v14  ;;  %v169_v50 = vrot.slane %v155_v35, %v2905_v14  ;;  %v188_v51 = vcombine.low %v102_v33, %v103_v36  ;;  %v2796_v4 = vmov 0.0  }
  0x53   :  { %v153_v39 = vcombine.low %v145_v29, %v152_v30  ;;  %v457_v44 = vld [vmem:[#allocation9 + $0x90] sm:$0xff]  ;;  %2443 = vmatprep.subr.bf16.mxu0 %v2442_v25  ;;  %v2450_v46 = vpack.c.bf16 %v456_v43, %v455_v42  ;;  %v458_v47 = vld [vmem:[#allocation9 + $0x98] sm:$0xff]  ;;  %v189_v52 = vcombine.low %v104_v37, %v105_v38  ;;  %v179_v53 = vrot.slane %v171_v40, %v2905_v14  ;;  %v459_v60 = vld [vmem:[#allocation9 + $0xa0] sm:$0xff] }
  0x54   :  { %v2454_v48 = vpack.c.bf16 %v458_v47, %v457_v44  ;;  %v186_v54 = vrot.slane %v172_v41, %v2905_v14  ;;  %v170_v55 = vcombine.low %v162_v49, %v169_v50  ;;  %v196_v56 = vrot.slane %v188_v51, %v2905_v14  ;;  %v460_v61 = vld [vmem:[#allocation9 + $0xa8] sm:$0xff]  ;;  %v461_v63 = vld [vmem:[#allocation9 + $0xb0] sm:$0xff]  ;;  %v462_v0 = vld [vmem:[#allocation9 + $0xb8] sm:$0xff]  ;;  %82 = vst [vmem:[#allocation2] sm:$0x3] %v2796_v4 }
  0x55   :  { %2200 = vmatprep.mubr.msk.f32.mxu0 %vm205_vm0, %v153_v39  ;;  %2451 = vmatprep.subr.bf16.mxu1 %v2450_v46  ;;  %v203_v57 = vrot.slane %v189_v52, %v2905_v14  ;;  %v2458_v62 = vpack.c.bf16 %v460_v61, %v459_v60  ;;  %v2462_v1 = vpack.c.bf16 %v462_v0, %v461_v63  ;;  %v463_v2 = vld [vmem:[#allocation9 + $0xc0] sm:$0xff]  ;;  %v464_v3 = vld [vmem:[#allocation9 + $0xc8] sm:$0xff]  ;;  %v465_v6 = vld [vmem:[#allocation9 + $0xd0] sm:$0xff] }
  0x56   :  { %2445 = vmatpush3.bf16.msra.mxu0 %v2442_v25  ;;  %2453 = vmatpush3.bf16.msra.mxu1 %v2450_v46  ;;  %v187_v58 = vcombine.low %v179_v53, %v186_v54  ;;  %84 = vst [vmem:[#allocation2 + $0x22] sm:$0x3] %v2796_v4  ;;  %85 = vst [vmem:[#allocation3] sm:$0x3] %v2796_v4  ;;  %v2466_v5 = vpack.c.bf16 %v464_v3, %v463_v2  ;;  %v466_v7 = vld [vmem:[#allocation9 + $0xd8] sm:$0xff]  ;;  %v467_v9 = vld [vmem:[#allocation9 + $0xe0] sm:$0xff] }
  0x57   :  { %2447 = vmatprep.subr.bf16.mxu0 %v2446_v45  ;;  %2455 = vmatprep.subr.bf16.mxu1 %v2454_v48  ;;  %v204_v59 = vcombine.low %v196_v56, %v203_v57  ;;  %87 = vst [vmem:[#allocation3 + $0x22] sm:$0x3] %v2796_v4  ;;  %v2470_v8 = vpack.c.bf16 %v466_v7, %v465_v6  ;;  %v468_v10 = vld [vmem:[#allocation9 + $0xe8] sm:$0xff]  ;;  %v469_v12 = vld [vmem:[#allocation9 + $0xf0] sm:$0xff]  ;;  %v470_v13 = vld [vmem:[#allocation9 + $0xf8] sm:$0xff] }
  0x58   :  { %v2474_v11 = vpack.c.bf16 %v468_v10, %v467_v9  ;;  %v2478_v15 = vpack.c.bf16 %v470_v13, %v469_v12  ;;  %v423_v16 = vld [vmem:[#allocation9] sm:$0xff]  ;;  %v424_v17 = vld [vmem:[#allocation9 + $0x8] sm:$0xff]  ;;  %v1200_v21 = vld [vmem:[#allocation10 + $0x90] sm:$0xff] }
  0x59   :  { %v2919_v18 = vpack.c.bf16 %v424_v17, %v423_v16  ;;  %v1198_v19 = vld [vmem:[#allocation10 + $0x80] sm:$0xff]  ;;  %v1199_v20 = vld [vmem:[#allocation10 + $0x88] sm:$0xff]  ;;  %v1201_v23 = vld [vmem:[#allocation10 + $0x98] sm:$0xff] }
  0x5a   :  { %2449 = vmatpush3.bf16.msra.mxu0 %v2446_v45  ;;  %2457 = vmatpush3.bf16.msra.mxu1 %v2454_v48  ;;  %v2546_v22 = vpack.c.bf16 %v1199_v20, %v1198_v19  ;;  %v2550_v24 = vpack.c.bf16 %v1201_v23, %v1200_v21  ;;  %v2021_v25 = vld [vmem:[%s3033_s2] ss:$0 sm:$0xff]  ;;  %v425_v19 = vld [vmem:[#allocation9 + $0x10] sm:$0xff] }
  0x5b   :  { %2459 = vmatprep.subr.bf16.mxu1 %v2458_v62  ;;  %v407_v3 = vld [vmem:[#allocation2] sm:$0x3] }
  0x5c   :  { %2547 = vmatprep.subr.bf16.mxu0 %v2546_v22  ;;  %v426_v20 = vld [vmem:[#allocation9 + $0x18] sm:$0xff] }
  0x5d   :  { %2201 = vmatmul.mubr.msk.f32.vlgmr.msra.gmra.mrb[0].mxu0 %vm205_vm0, %v170_v55 }
  0x5e   :  { %2203 = vmatprep.mubr.msk.f32.mxu0 %vm205_vm0, %v187_v58  ;;  %2461 = vmatpush3.bf16.msra.mxu1 %v2458_v62 }
  0x5f   :  { %2463 = vmatprep.subr.bf16.mxu1 %v2462_v1  ;;  %2549 = vmatpush3.bf16.msra.mxu0 %v2546_v22 }
  0x60   :  { %2551 = vmatprep.subr.bf16.mxu0 %v2550_v24 }
  0x61   :  { %2204 = vmatmul.mubr.msk.f32.gmra.mrb[2].mxu0 %vm205_vm0, %v204_v59 }
  0x62   :  { %2465 = vmatpush3.bf16.msra.mxu1 %v2462_v1 }
  0x63   :  { %2467 = vmatprep.subr.bf16.mxu1 %v2466_v5  ;;  %2553 = vmatpush3.bf16.msra.mxu0 %v2550_v24 }
  0x66   :  { %2469 = vmatpush3.bf16.msra.mxu1 %v2466_v5 }
  0x67   :  { %2471 = vmatprep.subr.bf16.mxu1 %v2470_v8 }
  0x6a   :  { %2473 = vmatpush3.bf16.msra.mxu1 %v2470_v8 }
  0x6b   :  { %2475 = vmatprep.subr.bf16.mxu1 %v2474_v11 }
  0x6e   :  { %2477 = vmatpush3.bf16.msra.mxu1 %v2474_v11 }
  0x6f   :  { %2479 = vmatprep.subr.bf16.mxu1 %v2478_v15 }
  0x72   :  { %2481 = vmatpush3.bf16.msra.mxu1 %v2478_v15 }
  0x73   :  { %2483 = vmatprep.subr.bf16.mxu1 %v2919_v18 }
 0x130   :  { %v2202_v26 = vpop.f32.mrb[0].mxu0 }
 0x131   :  { %v286_v27 = vadd.f32 %v2202_v26, %v2021_v25  ;;  %v280_v28 = vpop.f32.mrb[1].mxu0 }
 0x132   :  { %v281_v29 = vadd.f32 %v2021_v25, %v280_v28 }
 0x133   :  { %v320_v30 = vcombine.high %v286_v27, %v286_v27  ;;  %v327_v31 = vrot.slane %v286_v27, %v2905_v14  ;;  %2028 = vst.sshfl [vmem:[#allocation2 + $0xa] sm:$0x3 pattern:$0x76325410] %v286_v27 }
 0x134   :  { %v303_v32 = vcombine.high %v281_v29, %v281_v29  ;;  %v310_v33 = vrot.slane %v281_v29, %v2905_v14  ;;  %2026 = vst.sshfl [vmem:[#allocation2 + $0x2] sm:$0x3 pattern:$0x76325410] %v281_v29  ;;  %v2205_v34 = vpop.f32.mrb[2].mxu0 }
 0x135   :  { %v334_v35 = vrot.slane %v320_v30, %v2905_v14  ;;  %v335_v36 = vcombine.high %v327_v31, %v327_v31  ;;  %2029 = vst.sshfl [vmem:[#allocation2 + $0xe] sm:$0x3 pattern:$0x76325410] %v320_v30  ;;  %v296_v37 = vadd.f32 %v2205_v34, %v2021_v25  ;;  %v290_v38 = vpop.f32.mrb[3].mxu0 }
 0x136   :  { %v317_v39 = vrot.slane %v303_v32, %v2905_v14  ;;  %v318_v40 = vcombine.high %v310_v33, %v310_v33  ;;  %2027 = vst.sshfl [vmem:[#allocation2 + $0x6] sm:$0x3 pattern:$0x76325410] %v303_v32  ;;  %v291_v41 = vadd.f32 %v2021_v25, %v290_v38  ;;  %v2486_v32 = vpack.c.bf16 %v426_v20, %v425_v19 }
 0x137   :  { %v336_v42 = vcombine.high %v334_v35, %v334_v35  ;;  %395 = vst [vmem:[#allocation2 + $0xc] sm:$0x3] %v335_v36  ;;  %v354_v43 = vcombine.high %v296_v37, %v296_v37  ;;  %v361_v44 = vrot.slane %v296_v37, %v2905_v14  ;;  %2032 = vst.sshfl [vmem:[#allocation2 + $0x1a] sm:$0x3 pattern:$0x76325410] %v296_v37 }
 0x138   :  { %v319_v45 = vcombine.high %v317_v39, %v317_v39  ;;  %391 = vst [vmem:[#allocation2 + $0x4] sm:$0x3] %v318_v40  ;;  %v337_v46 = vcombine.high %v291_v41, %v291_v41  ;;  %v344_v47 = vrot.slane %v291_v41, %v2905_v14  ;;  %2030 = vst.sshfl [vmem:[#allocation2 + $0x12] sm:$0x3 pattern:$0x76325410] %v291_v41 }
 0x139   :  { %397 = vst [vmem:[#allocation2 + $0x10] sm:$0x3] %v336_v42  ;;  %v368_v48 = vrot.slane %v354_v43, %v2905_v14  ;;  %v369_v49 = vcombine.high %v361_v44, %v361_v44  ;;  %2033 = vst.sshfl [vmem:[#allocation2 + $0x1e] sm:$0x3 pattern:$0x76325410] %v354_v43 }
 0x13a   :  { %393 = vst [vmem:[#allocation2 + $0x8] sm:$0x3] %v319_v45  ;;  %v351_v50 = vrot.slane %v337_v46, %v2905_v14  ;;  %v352_v51 = vcombine.high %v344_v47, %v344_v47  ;;  %2031 = vst.sshfl [vmem:[#allocation2 + $0x16] sm:$0x3 pattern:$0x76325410] %v337_v46 }
 0x13b   :  { %v370_v52 = vcombine.high %v368_v48, %v368_v48  ;;  %403 = vst [vmem:[#allocation2 + $0x1c] sm:$0x3] %v369_v49  ;;  %v443_v54 = vld [vmem:[#allocation2 + $0xa] sm:$0x3]  ;;  %v439_v56 = vld [vmem:[#allocation2 + $0x2] sm:$0x3] }
 0x13c   :  { %v353_v53 = vcombine.high %v351_v50, %v351_v50  ;;  %399 = vst [vmem:[#allocation2 + $0x14] sm:$0x3] %v352_v51  ;;  %v445_v58 = vld [vmem:[#allocation2 + $0xe] sm:$0x3]  ;;  %v408_v8 = vld [vmem:[#allocation2 + $0x2] sm:$0x3] }
 0x13d   :  { %405 = vst [vmem:[#allocation2 + $0x20] sm:$0x3] %v370_v52  ;;  %v441_v59 = vld [vmem:[#allocation2 + $0x6] sm:$0x3]  ;;  %v660_v30 = vcombine.low %v407_v3, %v408_v8  ;;  %v427_v36 = vld [vmem:[#allocation9 + $0x20] sm:$0xff]  ;;  %v428_v37 = vld [vmem:[#allocation9 + $0x28] sm:$0xff] }
 0x13e   :  { %401 = vst [vmem:[#allocation2 + $0x18] sm:$0x3] %v353_v53  ;;  %v444_v55 = vld [vmem:[#allocation2 + $0xc] sm:$0x3]  ;;  %v451_v62 = vld [vmem:[#allocation2 + $0x1a] sm:$0x3]  ;;  %v2490_v41 = vpack.c.bf16 %v428_v37, %v427_v36 }
 0x13f   :  { %v440_v57 = vld [vmem:[#allocation2 + $0x4] sm:$0x3]  ;;  %v504_v0 = vcombine.low %v443_v54, %v444_v55  ;;  %v447_v2 = vld [vmem:[#allocation2 + $0x12] sm:$0x3]  ;;  %v410_v13 = vld [vmem:[#allocation2 + $0x6] sm:$0x3]  ;;  %v668_v40 = vrot.slane %v660_v30, %v2905_v14 }
 0x140   :  { %v487_v60 = vcombine.low %v439_v56, %v440_v57  ;;  %v446_v61 = vld [vmem:[#allocation2 + $0x10] sm:$0x3]  ;;  %v409_v4 = vld [vmem:[#allocation2 + $0x4] sm:$0x3]  ;;  %v453_v7 = vld [vmem:[#allocation2 + $0x1e] sm:$0x3] }
 0x141   :  { %v442_v63 = vld [vmem:[#allocation2 + $0x8] sm:$0x3]  ;;  %v505_v1 = vcombine.low %v445_v58, %v446_v61  ;;  %v449_v11 = vld [vmem:[#allocation2 + $0x16] sm:$0x3]  ;;  %v661_v22 = vcombine.low %v409_v4, %v410_v13  ;;  %v512_v23 = vrot.slane %v504_v0, %v2905_v14  ;;  %v429_v43 = vld [vmem:[#allocation9 + $0x30] sm:$0xff] }
 0x142   :  { %v488_v5 = vcombine.low %v441_v59, %v442_v63  ;;  %v452_v6 = vld [vmem:[#allocation2 + $0x1c] sm:$0x3]  ;;  %v495_v15 = vrot.slane %v487_v60, %v2905_v14  ;;  %v430_v44 = vld [vmem:[#allocation9 + $0x38] sm:$0xff]  ;;  %v431_v46 = vld [vmem:[#allocation9 + $0x40] sm:$0xff] }
 0x143   :  { %v519_v9 = vrot.slane %v505_v1, %v2905_v14  ;;  %v448_v10 = vld [vmem:[#allocation2 + $0x14] sm:$0x3]  ;;  %v538_v12 = vcombine.low %v451_v62, %v452_v6  ;;  %v675_v35 = vrot.slane %v661_v22, %v2905_v14  ;;  %v2494_v45 = vpack.c.bf16 %v430_v44, %v429_v43  ;;  %v434_v49 = vld [vmem:[#allocation9 + $0x58] sm:$0xff]  ;;  %v435_v51 = vld [vmem:[#allocation9 + $0x60] sm:$0xff] }
 0x144   :  { %v502_v16 = vrot.slane %v488_v5, %v2905_v14  ;;  %v521_v17 = vcombine.low %v447_v2, %v448_v10  ;;  %v454_v21 = vld [vmem:[#allocation2 + $0x20] sm:$0x3]  ;;  %v432_v47 = vld [vmem:[#allocation9 + $0x48] sm:$0xff]  ;;  %v437_v54 = vld [vmem:[#allocation9 + $0x70] sm:$0xff] }
 0x145   :  { %v450_v24 = vld [vmem:[#allocation2 + $0x18] sm:$0x3]  ;;  %v539_v25 = vcombine.low %v453_v7, %v454_v21  ;;  %v546_v26 = vrot.slane %v538_v12, %v2905_v14  ;;  %v520_v31 = vcombine.low %v512_v23, %v519_v9  ;;  %v676_v42 = vcombine.low %v668_v40, %v675_v35  ;;  %v436_v52 = vld [vmem:[#allocation9 + $0x68] sm:$0xff]  ;;  %v438_v55 = vld [vmem:[#allocation9 + $0x78] sm:$0xff] }
 0x146   :  { %v503_v27 = vcombine.low %v495_v15, %v502_v16  ;;  %v522_v28 = vcombine.low %v449_v11, %v450_v24  ;;  %v529_v29 = vrot.slane %v521_v17, %v2905_v14  ;;  %v2498_v48 = vpack.c.bf16 %v432_v47, %v431_v46  ;;  %v411_v56 = vld [vmem:[#allocation2 + $0x8] sm:$0x3]  ;;  %v417_v57 = vld [vmem:[#allocation2 + $0x14] sm:$0x3]  ;;  %v418_v58 = vld [vmem:[#allocation2 + $0x16] sm:$0x3] }
 0x147   :  { %v553_v33 = vrot.slane %v539_v25, %v2905_v14  ;;  %v2506_v53 = vpack.c.bf16 %v436_v52, %v435_v51  ;;  %v412_v59 = vld [vmem:[#allocation2 + $0xa] sm:$0x3]  ;;  %v413_v60 = vld [vmem:[#allocation2 + $0xc] sm:$0x3]  ;;  %v414_v61 = vld [vmem:[#allocation2 + $0xe] sm:$0x3]  ;;  %v2510_v0 = vpack.c.bf16 %v438_v55, %v437_v54  ;;  %v695_v5 = vcombine.low %v417_v57, %v418_v58 }
 0x148   :  { %2238 = vmatprep.mubr.f32.mxu1 %v503_v27  ;;  %v536_v34 = vrot.slane %v522_v28, %v2905_v14  ;;  %v836_v62 = vld [vmem:[#allocation9 + $0x100] sm:$0xff]  ;;  %v837_v63 = vld [vmem:[#allocation9 + $0x108] sm:$0xff]  ;;  %v677_v1 = vcombine.low %v411_v56, %v412_v59  ;;  %v420_v4 = vld [vmem:[#allocation2 + $0x1a] sm:$0x3]  ;;  %v678_v9 = vcombine.low %v413_v60, %v414_v61 }
 0x149   :  { %2239 = vmatmul.mubr.f32.vlgmr.msra.gmra.mrb[0].mxu1 %v520_v31  ;;  %v554_v38 = vcombine.low %v546_v26, %v553_v33  ;;  %v415_v2 = vld [vmem:[#allocation2 + $0x10] sm:$0x3]  ;;  %v416_v3 = vld [vmem:[#allocation2 + $0x12] sm:$0x3]  ;;  %v419_v6 = vld [vmem:[#allocation2 + $0x18] sm:$0x3]  ;;  %v2514_v13 = vpack.c.bf16 %v837_v63, %v836_v62  ;;  %v709_v20 = vrot.slane %v695_v5, %v2905_v14 }
 0x14a   :  { %2485 = vmatpush3.bf16.msra.mxu1 %v2919_v18  ;;  %v537_v39 = vcombine.low %v529_v29, %v536_v34  ;;  %v433_v18 = vld [vmem:[#allocation9 + $0x50] sm:$0xff]  ;;  %v822_v10 = vld [vmem:[#allocation2 + $0x8] sm:$0x3]  ;;  %v694_v11 = vcombine.low %v415_v2, %v416_v3  ;;  %v685_v12 = vrot.slane %v677_v1, %v2905_v14  ;;  %v711_v15 = vcombine.low %v419_v6, %v420_v4  ;;  %v820_v17 = vld [vmem:[#allocation2 + $0x4] sm:$0x3] }
 0x14b   :  { %2487 = vmatprep.subr.bf16.mxu1 %v2486_v32  ;;  %v2502_v50 = vpack.c.bf16 %v434_v49, %v433_v18  ;;  %v421_v7 = vld [vmem:[#allocation2 + $0x1c] sm:$0x3]  ;;  %v422_v8 = vld [vmem:[#allocation2 + $0x1e] sm:$0x3]  ;;  %v823_v19 = vld [vmem:[#allocation2 + $0xa] sm:$0x3]  ;;  %v692_v24 = vrot.slane %v678_v9, %v2905_v14 }
 0x14c   :  { %2241 = vmatprep.mubr.f32.mxu1 %v537_v39  ;;  %v712_v16 = vcombine.low %v421_v7, %v422_v8  ;;  %v838_v21 = vld [vmem:[#allocation9 + $0x110] sm:$0xff]  ;;  %v839_v22 = vld [vmem:[#allocation9 + $0x118] sm:$0xff]  ;;  %v869_v23 = vcombine.low %v822_v10, %v823_v19  ;;  %v702_v26 = vrot.slane %v694_v11, %v2905_v14  ;;  %v719_v29 = vrot.slane %v711_v15, %v2905_v14  ;;  %v840_v34 = vld [vmem:[#allocation9 + $0x120] sm:$0xff] }
 0x14d   :  { %2242 = vmatmul.mubr.f32.gmra.mrb[2].mxu1 %v554_v38  ;;  %v821_v25 = vld [vmem:[#allocation2 + $0x6] sm:$0x3]  ;;  %v693_v28 = vcombine.low %v685_v12, %v692_v24  ;;  %v2518_v31 = vpack.c.bf16 %v839_v22, %v838_v21  ;;  %v841_v35 = vld [vmem:[#allocation9 + $0x128] sm:$0xff]  ;;  %v842_v40 = vld [vmem:[#allocation9 + $0x130] sm:$0xff] }
 0x14e   :  { %2489 = vmatpush3.bf16.msra.mxu1 %v2486_v32  ;;  %2276 = vmatprep.mubr.f32.mxu1 %v676_v42  ;;  %v868_v27 = vcombine.low %v820_v17, %v821_v25  ;;  %v726_v30 = vrot.slane %v712_v16, %v2905_v14  ;;  %v710_v32 = vcombine.low %v702_v26, %v709_v20  ;;  %v844_v43 = vld [vmem:[#allocation9 + $0x140] sm:$0xff]  ;;  %v845_v44 = vld [vmem:[#allocation9 + $0x148] sm:$0xff]  ;;  %v846_v46 = vld [vmem:[#allocation9 + $0x150] sm:$0xff] }
 0x14f   :  { %2491 = vmatprep.subr.bf16.mxu1 %v2490_v41  ;;  %v883_v33 = vrot.slane %v869_v23, %v2905_v14  ;;  %v2522_v38 = vpack.c.bf16 %v841_v35, %v840_v34  ;;  %v847_v47 = vld [vmem:[#allocation9 + $0x158] sm:$0xff]  ;;  %v848_v18 = vld [vmem:[#allocation9 + $0x160] sm:$0xff]  ;;  %v849_v49 = vld [vmem:[#allocation9 + $0x168] sm:$0xff] }
 0x150   :  { %v876_v36 = vrot.slane %v868_v27, %v2905_v14  ;;  %v727_v37 = vcombine.low %v719_v29, %v726_v30  ;;  %v850_v51 = vld [vmem:[#allocation9 + $0x170] sm:$0xff]  ;;  %v851_v52 = vld [vmem:[#allocation9 + $0x178] sm:$0xff]  ;;  %v827_v54 = vld [vmem:[#allocation2 + $0x12] sm:$0x3] }
 0x151   :  { %v828_v55 = vld [vmem:[#allocation2 + $0x14] sm:$0x3]  ;;  %v829_v56 = vld [vmem:[#allocation2 + $0x16] sm:$0x3]  ;;  %v830_v57 = vld [vmem:[#allocation2 + $0x18] sm:$0x3]  ;;  %v2542_v60 = vpack.c.bf16 %v851_v52, %v850_v51 }
 0x152   :  { %2493 = vmatpush3.bf16.msra.mxu1 %v2490_v41  ;;  %v884_v39 = vcombine.low %v876_v36, %v883_v33  ;;  %v843_v41 = vld [vmem:[#allocation9 + $0x138] sm:$0xff]  ;;  %v831_v58 = vld [vmem:[#allocation2 + $0x1a] sm:$0x3]  ;;  %v824_v59 = vld [vmem:[#allocation2 + $0xc] sm:$0x3] }
 0x153   :  { %2495 = vmatprep.subr.bf16.mxu1 %v2494_v45  ;;  %v2526_v42 = vpack.c.bf16 %v843_v41, %v842_v40  ;;  %v825_v61 = vld [vmem:[#allocation2 + $0xe] sm:$0x3]  ;;  %v835_v63 = vld [vmem:[#allocation2 + $0x22] sm:$0x3]  ;;  %v903_v1 = vcombine.low %v830_v57, %v831_v58  ;;  %v832_v2 = vld [vmem:[#allocation2 + $0x1c] sm:$0x3] }
 0x154   :  { %v833_v3 = vld [vmem:[#allocation2 + $0x1e] sm:$0x3]  ;;  %v834_v4 = vld [vmem:[#allocation2 + $0x20] sm:$0x3]  ;;  %v885_v5 = vcombine.low %v824_v59, %v825_v61  ;;  %v1202_v19 = vld [vmem:[#allocation10 + $0xa0] sm:$0xff] }
 0x155   :  { %v919_v7 = vcombine.low %v832_v2, %v833_v3  ;;  %v920_v8 = vcombine.low %v834_v4, %v835_v63  ;;  %v917_v10 = vrot.slane %v903_v1, %v2905_v14  ;;  %v1203_v20 = vld [vmem:[#allocation10 + $0xa8] sm:$0xff]  ;;  %v1204_v22 = vld [vmem:[#allocation10 + $0xb0] sm:$0xff]  ;;  %v1205_v23 = vld [vmem:[#allocation10 + $0xb8] sm:$0xff] }
 0x156   :  { %2497 = vmatpush3.bf16.msra.mxu1 %v2494_v45  ;;  %v2530_v45 = vpack.c.bf16 %v845_v44, %v844_v43  ;;  %v893_v11 = vrot.slane %v885_v5, %v2905_v14  ;;  %v2554_v21 = vpack.c.bf16 %v1203_v20, %v1202_v19  ;;  %v2558_v24 = vpack.c.bf16 %v1205_v23, %v1204_v22  ;;  %v1206_v25 = vld [vmem:[#allocation10 + $0xc0] sm:$0xff]  ;;  %v1207_v26 = vld [vmem:[#allocation10 + $0xc8] sm:$0xff]  ;;  %v1208_v27 = vld [vmem:[#allocation10 + $0xd0] sm:$0xff] }
 0x157   :  { %2499 = vmatprep.subr.bf16.mxu1 %v2498_v48  ;;  %v934_v15 = vrot.slane %v920_v8, %v2905_v14  ;;  %v1209_v29 = vld [vmem:[#allocation10 + $0xd8] sm:$0xff]  ;;  %v1212_v34 = vld [vmem:[#allocation10 + $0xf0] sm:$0xff] }
 0x158   :  { %2555 = vmatprep.subr.bf16.mxu0 %v2554_v21  ;;  %v2566_v30 = vpack.c.bf16 %v1209_v29, %v1208_v27  ;;  %v1213_v35 = vld [vmem:[#allocation10 + $0xf8] sm:$0xff] }
 0x159   :  { %2557 = vmatpush3.bf16.msra.mxu0 %v2554_v21  ;;  %v2574_v36 = vpack.c.bf16 %v1213_v35, %v1212_v34  ;;  %v2034_v40 = vld [vmem:[%s3035_s4] ss:$0 sm:$0xff]  ;;  %v1150_v21 = vld [vmem:[#allocation3] sm:$0x3] }
 0x15a   :  { %2501 = vmatpush3.bf16.msra.mxu1 %v2498_v48  ;;  %v2534_v48 = vpack.c.bf16 %v847_v47, %v846_v46  ;;  %2559 = vmatprep.subr.bf16.mxu0 %v2558_v24 }
 0x15b   :  { %2503 = vmatprep.subr.bf16.mxu1 %v2502_v50 }
 0x15d   :  { %2561 = vmatpush3.bf16.msra.mxu0 %v2558_v24  ;;  %v1168_v24 = vld [vmem:[#allocation10 + $0x10] sm:$0xff] }
 0x15e   :  { %2505 = vmatpush3.bf16.msra.mxu1 %v2502_v50  ;;  %v2538_v50 = vpack.c.bf16 %v849_v49, %v848_v18 }
 0x15f   :  { %2507 = vmatprep.subr.bf16.mxu1 %v2506_v53 }
 0x162   :  { %2509 = vmatpush3.bf16.msra.mxu1 %v2506_v53  ;;  %v826_v53 = vld [vmem:[#allocation2 + $0x10] sm:$0x3] }
 0x163   :  { %2511 = vmatprep.subr.bf16.mxu1 %v2510_v0  ;;  %v886_v62 = vcombine.low %v826_v53, %v827_v54 }
 0x165   :  { %v900_v6 = vrot.slane %v886_v62, %v2905_v14 }
 0x166   :  { %2513 = vmatpush3.bf16.msra.mxu1 %v2510_v0  ;;  %v902_v0 = vcombine.low %v828_v55, %v829_v56 }
 0x167   :  { %2515 = vmatprep.subr.bf16.mxu1 %v2514_v13  ;;  %v901_v12 = vcombine.low %v893_v11, %v900_v6 }
 0x168   :  { %v910_v9 = vrot.slane %v902_v0, %v2905_v14 }
 0x169   :  { %2277 = vmatmul.mubr.f32.vlgmr.msra.gmra.mrb[0].mxu1 %v693_v28  ;;  %v2562_v28 = vpack.c.bf16 %v1207_v26, %v1206_v25  ;;  %v1169_v25 = vld [vmem:[#allocation10 + $0x18] sm:$0xff] }
 0x16a   :  { %2279 = vmatprep.mubr.f32.mxu1 %v710_v32  ;;  %2517 = vmatpush3.bf16.msra.mxu1 %v2514_v13  ;;  %v927_v13 = vrot.slane %v919_v7, %v2905_v14  ;;  %v918_v16 = vcombine.low %v910_v9, %v917_v10  ;;  %v1211_v32 = vld [vmem:[#allocation10 + $0xe8] sm:$0xff] }
 0x16b   :  { %2519 = vmatprep.subr.bf16.mxu1 %v2518_v31  ;;  %2563 = vmatprep.subr.bf16.mxu0 %v2562_v28 }
 0x16c   :  { %v935_v17 = vcombine.low %v927_v13, %v934_v15  ;;  %2565 = vmatpush3.bf16.msra.mxu0 %v2562_v28 }
 0x16d   :  { %2280 = vmatmul.mubr.f32.gmra.mrb[2].mxu1 %v727_v37  ;;  %2567 = vmatprep.subr.bf16.mxu0 %v2566_v30  ;;  %v1166_v37 = vld [vmem:[#allocation10] sm:$0xff] }
 0x16e   :  { %2521 = vmatpush3.bf16.msra.mxu1 %v2518_v31  ;;  %2314 = vmatprep.mubr.f32.mxu1 %v884_v39  ;;  %v1210_v31 = vld [vmem:[#allocation10 + $0xe0] sm:$0xff] }
 0x16f   :  { %2523 = vmatprep.subr.bf16.mxu1 %v2522_v38  ;;  %v2570_v33 = vpack.c.bf16 %v1211_v32, %v1210_v31 }
 0x170   :  { %2569 = vmatpush3.bf16.msra.mxu0 %v2566_v30 }
 0x171   :  { %2571 = vmatprep.subr.bf16.mxu0 %v2570_v33 }
 0x172   :  { %2525 = vmatpush3.bf16.msra.mxu1 %v2522_v38  ;;  %v1167_v38 = vld [vmem:[#allocation10 + $0x8] sm:$0xff] }
 0x173   :  { %2527 = vmatprep.subr.bf16.mxu1 %v2526_v42  ;;  %v2958_v39 = vpack.c.bf16 %v1167_v38, %v1166_v37 }
 0x174   :  { %2573 = vmatpush3.bf16.msra.mxu0 %v2570_v33 }
 0x175   :  { %2575 = vmatprep.subr.bf16.mxu0 %v2574_v36 }
 0x176   :  { %2529 = vmatpush3.bf16.msra.mxu1 %v2526_v42 }
 0x177   :  { %2531 = vmatprep.subr.bf16.mxu1 %v2530_v45 }
 0x178   :  { %2577 = vmatpush3.bf16.msra.mxu0 %v2574_v36 }
 0x179   :  { %2579 = vmatprep.subr.bf16.mxu0 %v2958_v39 }
 0x17a   :  { %2533 = vmatpush3.bf16.msra.mxu1 %v2530_v45 }
 0x17b   :  { %2535 = vmatprep.subr.bf16.mxu1 %v2534_v48 }
 0x17e   :  { %2537 = vmatpush3.bf16.msra.mxu1 %v2534_v48 }
 0x17f   :  { %2539 = vmatprep.subr.bf16.mxu1 %v2538_v50 }
 0x182   :  { %2541 = vmatpush3.bf16.msra.mxu1 %v2538_v50 }
 0x183   :  { %2543 = vmatprep.subr.bf16.mxu1 %v2542_v60 }
 0x186   :  { %2545 = vmatpush3.bf16.msra.mxu1 %v2542_v60 }
 0x189   :  { %2315 = vmatmul.mubr.f32.vlgmr.msra.gmra.mrb[0].mxu1 %v901_v12 }
 0x18a   :  { %2317 = vmatprep.mubr.f32.mxu1 %v918_v16 }
 0x18d   :  { %2318 = vmatmul.mubr.f32.gmra.mrb[2].mxu1 %v935_v17 }
 0x25c   :  { %v2316_v41 = vpop.f32.mrb[0].mxu1 }
 0x25d   :  { %v1037_v42 = vadd.f32 %v2316_v41, %v2034_v40  ;;  %v1006_v43 = vpop.f32.mrb[1].mxu1 }
 0x25e   :  { %v1036_v44 = vadd.f32 %v2034_v40, %v1006_v43 }
 0x25f   :  { %v1041_v45 = vmax.f32 %v1037_v42, 0.0 }
 0x260   :  { %v1040_v46 = vmax.f32 %v1036_v44, 0.0  ;;  %v2319_v47 = vpop.f32.mrb[2].mxu1 }
 0x261   :  { %v1065_v48 = vcombine.high %v1041_v45, %v1041_v45  ;;  %v1072_v18 = vrot.slane %v1041_v45, %v2905_v14  ;;  %2037 = vst.sshfl [vmem:[#allocation3 + $0xa] sm:$0x3 pattern:$0x76325410] %v1041_v45  ;;  %v1039_v49 = vadd.f32 %v2319_v47, %v2034_v40  ;;  %v1016_v50 = vpop.f32.mrb[3].mxu1 }
 0x262   :  { %v1048_v51 = vcombine.high %v1040_v46, %v1040_v46  ;;  %v1055_v52 = vrot.slane %v1040_v46, %v2905_v14  ;;  %2035 = vst.sshfl [vmem:[#allocation3 + $0x2] sm:$0x3 pattern:$0x76325410] %v1040_v46  ;;  %v1038_v53 = vadd.f32 %v2034_v40, %v1016_v50 }
 0x263   :  { %v1079_v54 = vrot.slane %v1065_v48, %v2905_v14  ;;  %v1080_v55 = vcombine.high %v1072_v18, %v1072_v18  ;;  %2038 = vst.sshfl [vmem:[#allocation3 + $0xe] sm:$0x3 pattern:$0x76325410] %v1065_v48  ;;  %v1043_v56 = vmax.f32 %v1039_v49, 0.0  ;;  %v2582_v18 = vpack.c.bf16 %v1169_v25, %v1168_v24 }
 0x264   :  { %v1062_v57 = vrot.slane %v1048_v51, %v2905_v14  ;;  %v1063_v58 = vcombine.high %v1055_v52, %v1055_v52  ;;  %2036 = vst.sshfl [vmem:[#allocation3 + $0x6] sm:$0x3 pattern:$0x76325410] %v1048_v51  ;;  %v1042_v59 = vmax.f32 %v1038_v53, 0.0  ;;  %v1170_v53 = vld [vmem:[#allocation10 + $0x20] sm:$0xff] }
 0x265   :  { %v1081_v60 = vcombine.high %v1079_v54, %v1079_v54  ;;  %1138 = vst [vmem:[#allocation3 + $0xc] sm:$0x3] %v1080_v55  ;;  %v1099_v61 = vcombine.high %v1043_v56, %v1043_v56  ;;  %v1106_v62 = vrot.slane %v1043_v56, %v2905_v14  ;;  %2041 = vst.sshfl [vmem:[#allocation3 + $0x1a] sm:$0x3 pattern:$0x76325410] %v1043_v56 }
 0x266   :  { %v1064_v63 = vcombine.high %v1062_v57, %v1062_v57  ;;  %1134 = vst [vmem:[#allocation3 + $0x4] sm:$0x3] %v1063_v58  ;;  %v1082_v0 = vcombine.high %v1042_v59, %v1042_v59  ;;  %v1089_v1 = vrot.slane %v1042_v59, %v2905_v14  ;;  %2039 = vst.sshfl [vmem:[#allocation3 + $0x12] sm:$0x3 pattern:$0x76325410] %v1042_v59 }
 0x267   :  { %1140 = vst [vmem:[#allocation3 + $0x10] sm:$0x3] %v1081_v60  ;;  %v1113_v2 = vrot.slane %v1099_v61, %v2905_v14  ;;  %v1114_v3 = vcombine.high %v1106_v62, %v1106_v62  ;;  %2042 = vst.sshfl [vmem:[#allocation3 + $0x1e] sm:$0x3 pattern:$0x76325410] %v1099_v61 }
 0x268   :  { %1136 = vst [vmem:[#allocation3 + $0x8] sm:$0x3] %v1064_v63  ;;  %v1096_v4 = vrot.slane %v1082_v0, %v2905_v14  ;;  %v1097_v5 = vcombine.high %v1089_v1, %v1089_v1  ;;  %2040 = vst.sshfl [vmem:[#allocation3 + $0x16] sm:$0x3 pattern:$0x76325410] %v1082_v0 }
 0x269   :  { %v1115_v6 = vcombine.high %v1113_v2, %v1113_v2  ;;  %1146 = vst [vmem:[#allocation3 + $0x1c] sm:$0x3] %v1114_v3  ;;  %v1182_v9 = vld [vmem:[#allocation3 + $0x2] sm:$0x3]  ;;  %v1186_v12 = vld [vmem:[#allocation3 + $0xa] sm:$0x3] }
 0x26a   :  { %v1098_v7 = vcombine.high %v1096_v4, %v1096_v4  ;;  %1142 = vst [vmem:[#allocation3 + $0x14] sm:$0x3] %v1097_v5  ;;  %v1188_v13 = vld [vmem:[#allocation3 + $0xe] sm:$0x3]  ;;  %v1151_v27 = vld [vmem:[#allocation3 + $0x2] sm:$0x3] }
 0x26b   :  { %1148 = vst [vmem:[#allocation3 + $0x20] sm:$0x3] %v1115_v6  ;;  %v1184_v16 = vld [vmem:[#allocation3 + $0x6] sm:$0x3]  ;;  %v1403_v47 = vcombine.low %v1150_v21, %v1151_v27  ;;  %v1171_v54 = vld [vmem:[#allocation10 + $0x28] sm:$0xff]  ;;  %v1172_v61 = vld [vmem:[#allocation10 + $0x30] sm:$0xff] }
 0x26c   :  { %1144 = vst [vmem:[#allocation3 + $0x18] sm:$0x3] %v1098_v7  ;;  %v1187_v8 = vld [vmem:[#allocation3 + $0xc] sm:$0x3]  ;;  %v1153_v31 = vld [vmem:[#allocation3 + $0x6] sm:$0x3]  ;;  %v2586_v59 = vpack.c.bf16 %v1171_v54, %v1170_v53 }
 0x26d   :  { %v1183_v10 = vld [vmem:[#allocation3 + $0x4] sm:$0x3]  ;;  %v1247_v19 = vcombine.low %v1186_v12, %v1187_v8  ;;  %v1190_v29 = vld [vmem:[#allocation3 + $0x12] sm:$0x3]  ;;  %v1194_v35 = vld [vmem:[#allocation3 + $0x1a] sm:$0x3]  ;;  %v1411_v57 = vrot.slane %v1403_v47, %v2905_v14 }
 0x26e   :  { %v1230_v11 = vcombine.low %v1182_v9, %v1183_v10  ;;  %v1189_v15 = vld [vmem:[#allocation3 + $0x10] sm:$0x3]  ;;  %v1152_v22 = vld [vmem:[#allocation3 + $0x4] sm:$0x3]  ;;  %v1196_v36 = vld [vmem:[#allocation3 + $0x1e] sm:$0x3] }
 0x26f   :  { %v1185_v17 = vld [vmem:[#allocation3 + $0x8] sm:$0x3]  ;;  %v1248_v20 = vcombine.low %v1188_v13, %v1189_v15  ;;  %v1404_v38 = vcombine.low %v1152_v22, %v1153_v31  ;;  %v1255_v40 = vrot.slane %v1247_v19, %v2905_v14  ;;  %v1192_v41 = vld [vmem:[#allocation3 + $0x16] sm:$0x3]  ;;  %v1173_v62 = vld [vmem:[#allocation10 + $0x38] sm:$0xff] }
 0x270   :  { %v1231_v23 = vcombine.low %v1184_v16, %v1185_v17  ;;  %v1195_v26 = vld [vmem:[#allocation3 + $0x1c] sm:$0x3]  ;;  %v1238_v32 = vrot.slane %v1230_v11, %v2905_v14  ;;  %v2590_v63 = vpack.c.bf16 %v1173_v62, %v1172_v61  ;;  %v1174_v0 = vld [vmem:[#allocation10 + $0x40] sm:$0xff]  ;;  %v1175_v1 = vld [vmem:[#allocation10 + $0x48] sm:$0xff] }
 0x271   :  { %v1262_v28 = vrot.slane %v1248_v20, %v2905_v14  ;;  %v1191_v30 = vld [vmem:[#allocation3 + $0x14] sm:$0x3]  ;;  %v1281_v43 = vcombine.low %v1194_v35, %v1195_v26  ;;  %v1418_v52 = vrot.slane %v1404_v38, %v2905_v14  ;;  %v1177_v3 = vld [vmem:[#allocation10 + $0x58] sm:$0xff]  ;;  %v1178_v5 = vld [vmem:[#allocation10 + $0x60] sm:$0xff] }
 0x272   :  { %v1245_v33 = vrot.slane %v1231_v23, %v2905_v14  ;;  %v1264_v34 = vcombine.low %v1190_v29, %v1191_v30  ;;  %v1197_v37 = vld [vmem:[#allocation3 + $0x20] sm:$0x3]  ;;  %v1176_v2 = vld [vmem:[#allocation10 + $0x50] sm:$0xff]  ;;  %v1179_v6 = vld [vmem:[#allocation10 + $0x68] sm:$0xff] }
 0x273   :  { %v1193_v42 = vld [vmem:[#allocation3 + $0x18] sm:$0x3]  ;;  %v1282_v44 = vcombine.low %v1196_v36, %v1197_v37  ;;  %v1263_v48 = vcombine.low %v1255_v40, %v1262_v28  ;;  %v1289_v55 = vrot.slane %v1281_v43, %v2905_v14  ;;  %v1419_v60 = vcombine.low %v1411_v57, %v1418_v52  ;;  %v1181_v9 = vld [vmem:[#allocation10 + $0x78] sm:$0xff]  ;;  %v1154_v10 = vld [vmem:[#allocation3 + $0x8] sm:$0x3] }
 0x274   :  { %v1246_v45 = vcombine.low %v1238_v32, %v1245_v33  ;;  %v1265_v46 = vcombine.low %v1192_v41, %v1193_v42  ;;  %v1272_v50 = vrot.slane %v1264_v34, %v2905_v14  ;;  %v2598_v4 = vpack.c.bf16 %v1177_v3, %v1176_v2  ;;  %v1180_v8 = vld [vmem:[#allocation10 + $0x70] sm:$0xff]  ;;  %v1155_v12 = vld [vmem:[#allocation3 + $0xa] sm:$0x3]  ;;  %v1156_v13 = vld [vmem:[#allocation3 + $0xc] sm:$0x3] }
 0x275   :  { %v1296_v49 = vrot.slane %v1282_v44, %v2905_v14  ;;  %v2602_v7 = vpack.c.bf16 %v1179_v6, %v1178_v5  ;;  %v1160_v11 = vld [vmem:[#allocation3 + $0x14] sm:$0x3]  ;;  %v1577_v15 = vld [vmem:[#allocation10 + $0x100] sm:$0xff]  ;;  %v2606_v16 = vpack.c.bf16 %v1181_v9, %v1180_v8  ;;  %v1420_v17 = vcombine.low %v1154_v10, %v1155_v12  ;;  %v1158_v19 = vld [vmem:[#allocation3 + $0x10] sm:$0x3] }
 0x276   :  { %2352 = vmatprep.mubr.f32.mxu0 %v1246_v45  ;;  %v1279_v51 = vrot.slane %v1265_v46, %v2905_v14  ;;  %v1159_v20 = vld [vmem:[#allocation3 + $0x12] sm:$0x3]  ;;  %v1161_v21 = vld [vmem:[#allocation3 + $0x16] sm:$0x3]  ;;  %v1157_v22 = vld [vmem:[#allocation3 + $0xe] sm:$0x3] }
 0x277   :  { %2353 = vmatmul.mubr.f32.vlgmr.msra.gmra.mrb[4].mxu0 %v1263_v48  ;;  %v1297_v58 = vcombine.low %v1289_v55, %v1296_v49  ;;  %v1578_v23 = vld [vmem:[#allocation10 + $0x108] sm:$0xff]  ;;  %v1438_v24 = vcombine.low %v1160_v11, %v1161_v21  ;;  %v1162_v25 = vld [vmem:[#allocation3 + $0x18] sm:$0x3]  ;;  %v1421_v26 = vcombine.low %v1156_v13, %v1157_v22  ;;  %v1563_v27 = vld [vmem:[#allocation3 + $0x8] sm:$0x3]  ;;  %v1437_v28 = vcombine.low %v1158_v19, %v1159_v20 }
 0x278   :  { %2581 = vmatpush3.bf16.msra.mxu0 %v2958_v39  ;;  %v1280_v56 = vcombine.low %v1272_v50, %v1279_v51  ;;  %v2594_v39 = vpack.c.bf16 %v1175_v1, %v1174_v0  ;;  %v1163_v29 = vld [vmem:[#allocation3 + $0x1a] sm:$0x3]  ;;  %v1164_v30 = vld [vmem:[#allocation3 + $0x1c] sm:$0x3]  ;;  %v1428_v31 = vrot.slane %v1420_v17, %v2905_v14  ;;  %v2610_v32 = vpack.c.bf16 %v1578_v23, %v1577_v15  ;;  %v1561_v34 = vld [vmem:[#allocation3 + $0x4] sm:$0x3] }
 0x279   :  { %2583 = vmatprep.subr.bf16.mxu0 %v2582_v18  ;;  %v1454_v33 = vcombine.low %v1162_v25, %v1163_v29  ;;  %v1564_v35 = vld [vmem:[#allocation3 + $0xa] sm:$0x3]  ;;  %v1452_v36 = vrot.slane %v1438_v24, %v2905_v14  ;;  %v1165_v37 = vld [vmem:[#allocation3 + $0x1e] sm:$0x3]  ;;  %v1579_v38 = vld [vmem:[#allocation10 + $0x110] sm:$0xff]  ;;  %v1435_v42 = vrot.slane %v1421_v26, %v2905_v14  ;;  %v1445_v45 = vrot.slane %v1437_v28, %v2905_v14 }
 0x27a   :  { %2355 = vmatprep.mubr.f32.mxu0 %v1280_v56  ;;  %v1580_v40 = vld [vmem:[#allocation10 + $0x118] sm:$0xff]  ;;  %v1610_v41 = vcombine.low %v1563_v27, %v1564_v35  ;;  %v1455_v43 = vcombine.low %v1164_v30, %v1165_v37  ;;  %v1562_v44 = vld [vmem:[#allocation3 + $0x6] sm:$0x3]  ;;  %v1582_v52 = vld [vmem:[#allocation10 + $0x128] sm:$0xff] }
 0x27b   :  { %2356 = vmatmul.mubr.f32.gmra.mrb[6].mxu0 %v1297_v58  ;;  %v1609_v46 = vcombine.low %v1561_v34, %v1562_v44  ;;  %v1436_v47 = vcombine.low %v1428_v31, %v1435_v42  ;;  %v1462_v48 = vrot.slane %v1454_v33, %v2905_v14  ;;  %v1453_v49 = vcombine.low %v1445_v45, %v1452_v36  ;;  %v1581_v51 = vld [vmem:[#allocation10 + $0x120] sm:$0xff]  ;;  %v1583_v58 = vld [vmem:[#allocation10 + $0x130] sm:$0xff]  ;;  %v1586_v62 = vld [vmem:[#allocation10 + $0x148] sm:$0xff] }
 0x27c   :  { %2585 = vmatpush3.bf16.msra.mxu0 %v2582_v18  ;;  %2390 = vmatprep.mubr.f32.mxu0 %v1419_v60  ;;  %v2614_v18 = vpack.c.bf16 %v1580_v40, %v1579_v38  ;;  %v1624_v50 = vrot.slane %v1610_v41, %v2905_v14  ;;  %v1469_v53 = vrot.slane %v1455_v43, %v2905_v14  ;;  %v1585_v61 = vld [vmem:[#allocation10 + $0x140] sm:$0xff]  ;;  %v1587_v0 = vld [vmem:[#allocation10 + $0x150] sm:$0xff]  ;;  %v1588_v1 = vld [vmem:[#allocation10 + $0x158] sm:$0xff] }
 0x27d   :  { %2587 = vmatprep.subr.bf16.mxu0 %v2586_v59  ;;  %v1617_v54 = vrot.slane %v1609_v46, %v2905_v14  ;;  %v2618_v56 = vpack.c.bf16 %v1582_v52, %v1581_v51  ;;  %v1589_v2 = vld [vmem:[#allocation10 + $0x160] sm:$0xff]  ;;  %v1590_v3 = vld [vmem:[#allocation10 + $0x168] sm:$0xff]  ;;  %v1591_v5 = vld [vmem:[#allocation10 + $0x170] sm:$0xff] }
 0x27e   :  { %v1470_v55 = vcombine.low %v1462_v48, %v1469_v53  ;;  %v1592_v6 = vld [vmem:[#allocation10 + $0x178] sm:$0xff]  ;;  %v1568_v8 = vld [vmem:[#allocation3 + $0x12] sm:$0x3]  ;;  %v1571_v9 = vld [vmem:[#allocation3 + $0x18] sm:$0x3] }
 0x27f   :  { %v1625_v57 = vcombine.low %v1617_v54, %v1624_v50  ;;  %v1565_v10 = vld [vmem:[#allocation3 + $0xc] sm:$0x3]  ;;  %v2638_v11 = vpack.c.bf16 %v1592_v6, %v1591_v5  ;;  %v1569_v13 = vld [vmem:[#allocation3 + $0x14] sm:$0x3]  ;;  %v1572_v15 = vld [vmem:[#allocation3 + $0x1a] sm:$0x3] }
 0x280   :  { %2589 = vmatpush3.bf16.msra.mxu0 %v2586_v59  ;;  %v1584_v59 = vld [vmem:[#allocation10 + $0x138] sm:$0xff]  ;;  %v1644_v17 = vcombine.low %v1571_v9, %v1572_v15  ;;  %v1570_v22 = vld [vmem:[#allocation3 + $0x16] sm:$0x3]  ;;  %v1777_v37 = vld [vmem:[#allocation2 + $0x10] sm:$0x3] }
 0x281   :  { %2591 = vmatprep.subr.bf16.mxu0 %v2590_v63  ;;  %v2622_v60 = vpack.c.bf16 %v1584_v59, %v1583_v58  ;;  %v1575_v19 = vld [vmem:[#allocation3 + $0x20] sm:$0x3]  ;;  %v1576_v20 = vld [vmem:[#allocation3 + $0x22] sm:$0x3]  ;;  %v1643_v23 = vcombine.low %v1569_v13, %v1570_v22  ;;  %v1573_v24 = vld [vmem:[#allocation3 + $0x1c] sm:$0x3] }
 0x282   :  { %v1661_v26 = vcombine.low %v1575_v19, %v1576_v20  ;;  %v1658_v27 = vrot.slane %v1644_v17, %v2905_v14  ;;  %v1574_v28 = vld [vmem:[#allocation3 + $0x1e] sm:$0x3]  ;;  %v1773_v38 = vld [vmem:[#allocation2 + $0x8] sm:$0x3]  ;;  %v1774_v40 = vld [vmem:[#allocation2 + $0xa] sm:$0x3] }
 0x283   :  { %v1660_v30 = vcombine.low %v1573_v24, %v1574_v28  ;;  %v1651_v31 = vrot.slane %v1643_v23, %v2905_v14  ;;  %v1775_v41 = vld [vmem:[#allocation2 + $0xc] sm:$0x3]  ;;  %v1776_v42 = vld [vmem:[#allocation2 + $0xe] sm:$0x3]  ;;  %v1771_v43 = vld [vmem:[#allocation2 + $0x4] sm:$0x3] }
 0x284   :  { %2593 = vmatpush3.bf16.msra.mxu0 %v2590_v63  ;;  %v2626_v63 = vpack.c.bf16 %v1586_v62, %v1585_v61  ;;  %v1675_v33 = vrot.slane %v1661_v26, %v2905_v14  ;;  %v1831_v44 = vcombine.low %v1776_v42, %v1777_v37  ;;  %v1770_v45 = vld [vmem:[#allocation2 + $0x2] sm:$0x3]  ;;  %v1772_v46 = vld [vmem:[#allocation2 + $0x6] sm:$0x3]  ;;  %v1783_v48 = vld [vmem:[#allocation2 + $0x1c] sm:$0x3]  ;;  %v1830_v52 = vcombine.low %v1774_v40, %v1775_v41 }
 0x285   :  { %2595 = vmatprep.subr.bf16.mxu0 %v2594_v39  ;;  %v1659_v34 = vcombine.low %v1651_v31, %v1658_v27  ;;  %v1668_v35 = vrot.slane %v1660_v30, %v2905_v14  ;;  %v1785_v50 = vld [vmem:[#allocation2 + $0x20] sm:$0x3]  ;;  %v1778_v51 = vld [vmem:[#allocation2 + $0x12] sm:$0x3]  ;;  %v1779_v53 = vld [vmem:[#allocation2 + $0x14] sm:$0x3] }
 0x286   :  { %v1780_v54 = vld [vmem:[#allocation2 + $0x16] sm:$0x3]  ;;  %v1847_v62 = vcombine.low %v1778_v51, %v1779_v53 }
 0x287   :  { %v1676_v36 = vcombine.low %v1668_v35, %v1675_v33 }
 0x288   :  { %2597 = vmatpush3.bf16.msra.mxu0 %v2594_v39  ;;  %v2630_v39 = vpack.c.bf16 %v1588_v1, %v1587_v0  ;;  %v1838_v0 = vrot.slane %v1830_v52, %v2905_v14  ;;  %v1855_v9 = vrot.slane %v1847_v62, %v2905_v14 }
 0x289   :  { %2599 = vmatprep.subr.bf16.mxu0 %v2598_v4 }
 0x28c   :  { %2601 = vmatpush3.bf16.msra.mxu0 %v2598_v4  ;;  %v2634_v4 = vpack.c.bf16 %v1590_v3, %v1589_v2 }
 0x28d   :  { %2603 = vmatprep.subr.bf16.mxu0 %v2602_v7 }
 0x290   :  { %2605 = vmatpush3.bf16.msra.mxu0 %v2602_v7  ;;  %v1567_v7 = vld [vmem:[#allocation3 + $0x10] sm:$0x3] }
 0x291   :  { %2607 = vmatprep.subr.bf16.mxu0 %v2606_v16  ;;  %v1627_v12 = vcombine.low %v1567_v7, %v1568_v8 }
 0x293   :  { %v1641_v25 = vrot.slane %v1627_v12, %v2905_v14 }
 0x294   :  { %2609 = vmatpush3.bf16.msra.mxu0 %v2606_v16  ;;  %v1566_v16 = vld [vmem:[#allocation3 + $0xe] sm:$0x3] }
 0x295   :  { %2611 = vmatprep.subr.bf16.mxu0 %v2610_v32  ;;  %v1626_v21 = vcombine.low %v1565_v10, %v1566_v16 }
 0x297   :  { %2391 = vmatmul.mubr.f32.vlgmr.msra.gmra.mrb[4].mxu0 %v1436_v47  ;;  %v1634_v29 = vrot.slane %v1626_v21, %v2905_v14  ;;  %v1782_v47 = vld [vmem:[#allocation2 + $0x1a] sm:$0x3] }
 0x298   :  { %2393 = vmatprep.mubr.f32.mxu0 %v1453_v49  ;;  %2613 = vmatpush3.bf16.msra.mxu0 %v2610_v32  ;;  %v1784_v49 = vld [vmem:[#allocation2 + $0x1e] sm:$0x3]  ;;  %v1864_v58 = vcombine.low %v1782_v47, %v1783_v48 }
 0x299   :  { %2615 = vmatprep.subr.bf16.mxu0 %v2614_v18  ;;  %v1642_v32 = vcombine.low %v1634_v29, %v1641_v25  ;;  %v1865_v59 = vcombine.low %v1784_v49, %v1785_v50 }
 0x29a   :  { %v1872_v5 = vrot.slane %v1864_v58, %v2905_v14 }
 0x29b   :  { %2394 = vmatmul.mubr.f32.gmra.mrb[6].mxu0 %v1470_v55  ;;  %v1781_v55 = vld [vmem:[#allocation2 + $0x18] sm:$0x3]  ;;  %v1879_v6 = vrot.slane %v1865_v59, %v2905_v14 }
 0x29c   :  { %2617 = vmatpush3.bf16.msra.mxu0 %v2614_v18  ;;  %2428 = vmatprep.mubr.f32.mxu0 %v1625_v57  ;;  %v1814_v18 = vcombine.low %v1772_v46, %v1773_v38  ;;  %v1845_v57 = vrot.slane %v1831_v44, %v2905_v14 }
 0x29d   :  { %2619 = vmatprep.subr.bf16.mxu0 %v2618_v56  ;;  %v1880_v17 = vcombine.low %v1872_v5, %v1879_v6 }
 0x29e   :  { %v1828_v61 = vrot.slane %v1814_v18, %v2905_v14  ;;  %v1846_v3 = vcombine.low %v1838_v0, %v1845_v57 }
 0x2a0   :  { %2621 = vmatpush3.bf16.msra.mxu0 %v2618_v56  ;;  %v1813_v56 = vcombine.low %v1770_v45, %v1771_v43 }
 0x2a1   :  { %2623 = vmatprep.subr.bf16.mxu0 %v2622_v60 }
 0x2a4   :  { %2625 = vmatpush3.bf16.msra.mxu0 %v2622_v60  ;;  %v2043_v60 = vld [vmem:[%s3037_s6] ss:$0 sm:$0xff]  ;;  %s2797_s6 = smov [#allocation12]  }
 0x2a5   :  { %2627 = vmatprep.subr.bf16.mxu0 %v2626_v63  ;;  %s2003_s8 = sshll.u32 %s2797_s6, 4  ;;  %s2004_s8 = int_to_ptr.vmem [resolvable:$true] %s2003_s8 }
 0x2a6   :  { %s2757_s9 = scalar_lea.vmem %s2004_s8, 512  ;;  %p2762_p5 = scmp.lt.s32.totalorder %s2004_s8, %s2004_s8 }
 0x2a7   :  { %p2758_p4 = scmp.ne.s32.totalorder %s2004_s8, %s2757_s9  ;;  %p2763_p6 = scmp.lt.s32.totalorder %s2757_s9, %s2757_s9 }
 0x2a8   :  { %2629 = vmatpush3.bf16.msra.mxu0 %v2626_v63  ;;  %v1848_v63 = vcombine.low %v1780_v54, %v1781_v55 }
 0x2a9   :  { %2631 = vmatprep.subr.bf16.mxu0 %v2630_v39  ;;  %p2764_p7 = por %p2763_p6, %p2762_p5 }
 0x2aa   :  { %v1862_v10 = vrot.slane %v1848_v63, %v2905_v14 }
 0x2ab   :  { %p2765_p8 = pnand %p2764_p7, %p2758_p4 }
 0x2ac   :  { %2633 = vmatpush3.bf16.msra.mxu0 %v2630_v39  ;;  %v1821_v39 = vrot.slane %v1813_v56, %v2905_v14  ;;  %v1863_v22 = vcombine.low %v1855_v9, %v1862_v10 }
 0x2ad   :  { %2635 = vmatprep.subr.bf16.mxu0 %v2634_v4 }
 0x2ae   :  { %v1829_v8 = vcombine.low %v1821_v39, %v1828_v61 }
 0x2b0   :  { %2637 = vmatpush3.bf16.msra.mxu0 %v2634_v4 }
 0x2b1   :  { %2639 = vmatprep.subr.bf16.mxu0 %v2638_v11 }
 0x2b4   :  { %2641 = vmatpush3.bf16.msra.mxu0 %v2638_v11 }
 0x2b7   :  { %2429 = vmatmul.mubr.f32.vlgmr.msra.gmra.mrb[4].mxu0 %v1642_v32 }
 0x2b8   :  { %2431 = vmatprep.mubr.f32.mxu0 %v1659_v34 }
 0x2bb   :  { %2432 = vmatmul.mubr.f32.gmra.mrb[6].mxu0 %v1676_v36 }
 0x38a   :  { %v2430_v1 = vpop.f32.mrb[4].mxu0 }
 0x38b   :  { %v1794_v2 = vadd.f32 %v2430_v1, %v2043_v60  ;;  %v1747_v4 = vpop.f32.mrb[5].mxu0 }
 0x38c   :  { %v1793_v7 = vadd.f32 %v2043_v60, %v1747_v4 }
 0x38d   :  { %v1886_v11 = vadd.f32 %v1846_v3, %v1794_v2 }
 0x38e   :  { %v1885_v12 = vadd.f32 %v1829_v8, %v1793_v7  ;;  %v2433_v13 = vpop.f32.mrb[6].mxu0 }
 0x38f   :  { %v1890_v15 = vmax.f32 %v1886_v11, 0.0  ;;  %v1796_v16 = vadd.f32 %v2433_v13, %v2043_v60  ;;  %v1757_v19 = vpop.f32.mrb[7].mxu0 }
 0x390   :  { %v1889_v20 = vmax.f32 %v1885_v12, 0.0  ;;  %v1795_v21 = vadd.f32 %v2043_v60, %v1757_v19 }
 0x391   :  { %v1914_v23 = vcombine.high %v1890_v15, %v1890_v15  ;;  %v1921_v24 = vrot.slane %v1890_v15, %v2905_v14  ;;  %2046 = vst.sshfl [vmem:[#allocation12 + $0x8] sm:$0x3 pattern:$0x76325410] %v1890_v15  ;;  %v1888_v25 = vadd.f32 %v1880_v17, %v1796_v16 }
 0x392   :  { %v1897_v26 = vcombine.high %v1889_v20, %v1889_v20  ;;  %v1904_v27 = vrot.slane %v1889_v20, %v2905_v14  ;;  %2044 = vst.sshfl [vmem:[#allocation12] sm:$0x3 pattern:$0x76325410] %v1889_v20  ;;  %v1887_v28 = vadd.f32 %v1863_v22, %v1795_v21 }
 0x393   :  { %v1928_v29 = vrot.slane %v1914_v23, %v2905_v14  ;;  %v1929_v30 = vcombine.high %v1921_v24, %v1921_v24  ;;  %2047 = vst.sshfl [vmem:[#allocation12 + $0xc] sm:$0x3 pattern:$0x76325410] %v1914_v23  ;;  %v1892_v31 = vmax.f32 %v1888_v25, 0.0 }
 0x394   :  { %v1911_v32 = vrot.slane %v1897_v26, %v2905_v14  ;;  %v1912_v33 = vcombine.high %v1904_v27, %v1904_v27  ;;  %2045 = vst.sshfl [vmem:[#allocation12 + $0x4] sm:$0x3 pattern:$0x76325410] %v1897_v26  ;;  %v1891_v34 = vmax.f32 %v1887_v28, 0.0 }
 0x395   :  { %v1930_v35 = vcombine.high %v1928_v29, %v1928_v29  ;;  %1987 = vst [vmem:[#allocation12 + $0xa] sm:$0x3] %v1929_v30  ;;  %v1948_v36 = vcombine.high %v1892_v31, %v1892_v31  ;;  %v1955_v37 = vrot.slane %v1892_v31, %v2905_v14  ;;  %2050 = vst.sshfl [vmem:[#allocation12 + $0x18] sm:$0x3 pattern:$0x76325410] %v1892_v31 }
 0x396   :  { %v1913_v38 = vcombine.high %v1911_v32, %v1911_v32  ;;  %1983 = vst [vmem:[#allocation12 + $0x2] sm:$0x3] %v1912_v33  ;;  %v1931_v40 = vcombine.high %v1891_v34, %v1891_v34  ;;  %v1938_v41 = vrot.slane %v1891_v34, %v2905_v14  ;;  %2048 = vst.sshfl [vmem:[#allocation12 + $0x10] sm:$0x3 pattern:$0x76325410] %v1891_v34 }
 0x397   :  { %1989 = vst [vmem:[#allocation12 + $0xe] sm:$0x3] %v1930_v35  ;;  %v1962_v42 = vrot.slane %v1948_v36, %v2905_v14  ;;  %v1963_v43 = vcombine.high %v1955_v37, %v1955_v37  ;;  %2051 = vst.sshfl [vmem:[#allocation12 + $0x1c] sm:$0x3 pattern:$0x76325410] %v1948_v36 }
 0x398   :  { %1985 = vst [vmem:[#allocation12 + $0x6] sm:$0x3] %v1913_v38  ;;  %v1945_v44 = vrot.slane %v1931_v40, %v2905_v14  ;;  %v1946_v45 = vcombine.high %v1938_v41, %v1938_v41  ;;  %2049 = vst.sshfl [vmem:[#allocation12 + $0x14] sm:$0x3 pattern:$0x76325410] %v1931_v40 }
 0x399   :  { %v1964_v46 = vcombine.high %v1962_v42, %v1962_v42  ;;  %1995 = vst [vmem:[#allocation12 + $0x1a] sm:$0x3] %v1963_v43 }
 0x39a   :  { %v1947_v47 = vcombine.high %v1945_v44, %v1945_v44  ;;  %1991 = vst [vmem:[#allocation12 + $0x12] sm:$0x3] %v1946_v45 }
 0x39b   :  { %1997 = vst [vmem:[#allocation12 + $0x1e] sm:$0x3] %v1964_v46 }
 0x39c   :  { %1993 = vst [vmem:[#allocation12 + $0x16] sm:$0x3] %v1947_v47 }
 0x39d   :  { %2768 = shalt.err (!%p2765_p8)
}
 0x39e   :  { %s2769_s14 = scalar_lea.hbm %s3038_s7, 512 }
 0x39f   :  { %p2770_p9 = scmp.ne.s32.totalorder %s3038_s7, %s2769_s14  ;;  %p2773_p10 = scmp.lt.u32.totalorder %s2769_s14, %s3038_s7 }
 0x3a1   :  { %p2775_p11 = pnand %p2773_p10, %p2770_p9 }
 0x3a3   :  { %2778 = shalt.err (!%p2775_p11)
}
 0x3a4   :  { %2009 = dma.vmem_to_hbm [thread:$0]  %s2004_s8, 512, %s3038_s7, [#allocation6], %s2791_s1, %s2791_s1, %s2792_s25  }
 0x3a5   :  { %2785 = dma.done.wait [#allocation6], 512  }
 0x3a6   :  { %2786 = vsyncadd [#allocation6], 4294966784 }
 0x3a7   :  { %2013 = vsyncpa [#allocation5], 1 }
 0x3a8   :  { %2014 = vsyncpa [#allocation8], 1 }
 0x3a9   :  { %2015 = vsyncpa [#allocation11], 1 }
 0x3aa   :  { %2016 = vsyncpa [#allocation6], 1 }

</bundles_post_ra>
